<compile_context>
chip_gen: v7x
topology: tpu7x:2x2x1
jax: 0.10.0
libtpu: 0.0.40
codegen_flags: <defaults>
</compile_context>

<pallas_src>
import jax
import jax.numpy as jnp
from jax import lax
from jax.experimental import pallas as pl
from jax.experimental.pallas import tpu as pltpu

# ----------------------------- model constants ------------------------------
IN_FEATS = 16
N_HIDDEN = 32
N_OBJECTS = 10
N_STATES = 6
SBERT_VECTOR_SIZE = 48
PRETRAINED_VECTOR_SIZE = 24
N_RELATIONS = 7                       # len(all_relations)
NREL1 = N_RELATIONS + 1               # len(all_relations) + 1
ETYPES = ['Near', 'In', 'On', 'Grasping', 'Empty']
N_ETYPES = len(ETYPES)
SEM_HIDDEN = 16                       # semantic-attention hidden size
N_NODES = 8
N_GOAL_OBJ = 3
LSTM_IN = NREL1 + 2 * PRETRAINED_VECTOR_SIZE   # pred_lstm input size = 56

PRELU_ALPHA = 0.25                    # shared nn.PReLU() slope (compile-time const)
GUMBEL_TAU = 0.01
LEAKY_SLOPE = 0.2                     # GATConv LeakyReLU negative slope

_F32 = jnp.float32


# =============================================================================
# Kernel 1: per-meta-path GAT + semantic projection, grid=(N_ETYPES,)
# =============================================================================
def _gat_sem_kernel(feats_ref, adj_ref, wt_ref, al_ref, ar_ref, b_ref,
                    semw1t_ref, semb1_ref, semw2t_ref,
                    z_ref, score_ref):
    h = feats_ref[...]                                                # (N, F)
    z = jnp.dot(h, wt_ref[0], preferred_element_type=jnp.float32)     # (N, F)
    er = jnp.dot(z, ar_ref[0], preferred_element_type=jnp.float32)    # (N, 1) dst score
    el = lax.dot_general(al_ref[0], z, (((1,), (1,)), ((), ())),
                         preferred_element_type=jnp.float32)          # (1, N) src score
    e = er + el                                                       # e[i,j] = er_i + el_j
    e = jnp.where(e >= 0.0, e, LEAKY_SLOPE * e)                       # LeakyReLU
    adj = adj_ref[0]                                                  # (N, N)
    e = jnp.where(adj > 0.0, e, -1e30)
    e = e - jnp.max(e, axis=1, keepdims=True)
    p = jnp.where(adj > 0.0, jnp.exp(e), 0.0)
    denom = jnp.maximum(jnp.sum(p, axis=1, keepdims=True), 1e-30)     # all-zero-row guard
    alpha = p / denom
    out = jnp.dot(alpha, z, preferred_element_type=jnp.float32) + b_ref[0]
    out = jnp.where(out > 0.0, out, jnp.exp(jnp.minimum(out, 0.0)) - 1.0)   # ELU
    z_ref[0] = out

    # fused semantic-attention projection for this meta-path
    proj = jnp.tanh(jnp.dot(out, semw1t_ref[...], preferred_element_type=jnp.float32)
                    + semb1_ref[...])                                 # (N, SEM_HIDDEN)
    s = jnp.dot(proj, semw2t_ref[...], preferred_element_type=jnp.float32)   # (N, 1)
    score_ref[0] = jnp.mean(s, keepdims=True)                         # (1, 1)


def gat_semantic(feats, adj, gat_wt, gat_al, gat_ar, gat_b, sem_w1t, sem_b1, sem_w2t):
    n, f = feats.shape
    e = adj.shape[0]
    out_shape = (jax.ShapeDtypeStruct((e, n, f), _F32),
                 jax.ShapeDtypeStruct((e, 1, 1), _F32))
    return pl.pallas_call(
        _gat_sem_kernel,
        grid=(e,),
        in_specs=[
            pl.BlockSpec((n, f), lambda i: (0, 0)),                 # feats (shared)
            pl.BlockSpec((1, n, n), lambda i: (i, 0, 0)),           # adj[e]
            pl.BlockSpec((1, f, f), lambda i: (i, 0, 0)),           # W[e]^T
            pl.BlockSpec((1, 1, f), lambda i: (i, 0, 0)),           # a_l[e]
            pl.BlockSpec((1, f, 1), lambda i: (i, 0, 0)),           # a_r[e]
            pl.BlockSpec((1, 1, f), lambda i: (i, 0, 0)),           # bias[e]
            pl.BlockSpec((f, SEM_HIDDEN), lambda i: (0, 0)),        # sem W1^T (shared)
            pl.BlockSpec((1, SEM_HIDDEN), lambda i: (0, 0)),        # sem b1
            pl.BlockSpec((SEM_HIDDEN, 1), lambda i: (0, 0)),        # sem W2^T
        ],
        out_specs=(
            pl.BlockSpec((1, n, f), lambda i: (i, 0, 0)),           # z_stack
            pl.BlockSpec((1, 1, 1), lambda i: (i, 0, 0)),           # semantic score
        ),
        out_shape=out_shape,
        compiler_params=pltpu.CompilerParams(dimension_semantics=("parallel",)),
    )(feats, adj, gat_wt, gat_al, gat_ar, gat_b, sem_w1t, sem_b1, sem_w2t)


# =============================================================================
# Kernel 2: semantic mix + embeds + pooling + skip + goal-obj attn + LSTM + fc
# =============================================================================
def _mid_kernel(feats_ref, z_stack_ref, beta_ref,
                goal_vec_ref, sbert_wt_ref, sbert_b_ref,
                gobj_ref, cnet_wt_ref, cnet_b_ref,
                skip_wt_ref, skip_b_ref,
                gembed_wt_ref, gembed_b_ref,
                goa_wt_ref, goa_b_ref,
                pred_ref, h0_ref, c0_ref, wih_t_ref, whh_t_ref, lstm_b_ref,
                fc_wt_ref, fc_b_ref,
                final_ref, h1_ref, c1_ref):
    def prelu(x):
        return jnp.where(x >= 0.0, x, PRELU_ALPHA * x)

    feats = feats_ref[...]                                            # (N, F)

    # semantic-attention combination of meta-path outputs (static 5-way sum)
    h_gcn = beta_ref[0] * z_stack_ref[0]
    for e in range(1, N_ETYPES):
        h_gcn = h_gcn + beta_ref[e] * z_stack_ref[e]                  # (N, F)

    # graph_attn / graph_attn_gcn: Softmax(dim=1) of (N,1) == 1.0  ->  column sum
    h_embed_pool = jnp.sum(feats, axis=0, keepdims=True)              # (1, F)
    h_gcn_pool = jnp.sum(h_gcn, axis=0, keepdims=True)                # (1, F)

    # skip_connection: Linear(2F -> 2) as partial dots + softmax over the 2 weights
    skip_wt = skip_wt_ref[...]                                        # (2F, 2)
    s = (jnp.dot(h_embed_pool, skip_wt[:IN_FEATS], preferred_element_type=jnp.float32)
         + jnp.dot(h_gcn_pool, skip_wt[IN_FEATS:], preferred_element_type=jnp.float32)
         + skip_b_ref[...])                                           # (1, 2)
    s = s - jnp.max(s, axis=1, keepdims=True)
    es = jnp.exp(s)
    w = es / jnp.sum(es, axis=1, keepdims=True)
    h_mix = w[:, 0:1] * h_embed_pool + w[:, 1:2] * h_gcn_pool         # (1, F)

    goal_embed = prelu(jnp.dot(goal_vec_ref[...], sbert_wt_ref[...],
                               preferred_element_type=jnp.float32) + sbert_b_ref[...])   # (1, H)
    h_embed = prelu(jnp.dot(h_mix, gembed_wt_ref[...],
                            preferred_element_type=jnp.float32) + gembed_b_ref[...])     # (1, H)
    gobj_embed = prelu(jnp.dot(gobj_ref[...], cnet_wt_ref[...],
                               preferred_element_type=jnp.float32) + cnet_b_ref[...])    # (G, H)

    # goal_obj_attention: Linear(2H -> 1) (partial dots), softmax over objects (dim=0)
    goa_wt = goa_wt_ref[...]                                          # (2H, 1)
    sc = (jnp.dot(h_embed, goa_wt[:N_HIDDEN], preferred_element_type=jnp.float32)
          + jnp.dot(gobj_embed, goa_wt[N_HIDDEN:], preferred_element_type=jnp.float32)
          + goa_b_ref[...])                                           # (G, 1)
    sc = sc - jnp.max(sc, axis=0, keepdims=True)
    ep = jnp.exp(sc)
    attn = ep / jnp.sum(ep, axis=0, keepdims=True)                    # (G, 1)
    gobj_pooled = lax.dot_general(attn, gobj_embed, (((0,), (0,)), ((), ())),
                                  preferred_element_type=jnp.float32)  # (1, H)

    # predicate LSTM cell (seq_len=1, batch=1); PyTorch gate order i, f, g, o
    gates = (jnp.dot(pred_ref[...], wih_t_ref[...], preferred_element_type=jnp.float32)
             + jnp.dot(h0_ref[...], whh_t_ref[...], preferred_element_type=jnp.float32)
             + lstm_b_ref[...])                                       # (1, 4H)
    i = jax.nn.sigmoid(gates[:, 0:N_HIDDEN])
    f = jax.nn.sigmoid(gates[:, N_HIDDEN:2 * N_HIDDEN])
    g = jnp.tanh(gates[:, 2 * N_HIDDEN:3 * N_HIDDEN])
    o = jax.nn.sigmoid(gates[:, 3 * N_HIDDEN:4 * N_HIDDEN])
    c1 = f * c0_ref[...] + i * g
    h1 = o * jnp.tanh(c1)
    h1_ref[...] = h1
    c1_ref[...] = c1

    # fc: Linear(4H -> H) over cat([h_embed, goal_obj, goal_embed, pred_hist]) as partial dots
    fc_wt = fc_wt_ref[...]                                            # (4H, H)
    fin = (jnp.dot(h_embed, fc_wt[0:N_HIDDEN], preferred_element_type=jnp.float32)
           + jnp.dot(gobj_pooled, fc_wt[N_HIDDEN:2 * N_HIDDEN], preferred_element_type=jnp.float32)
           + jnp.dot(goal_embed, fc_wt[2 * N_HIDDEN:3 * N_HIDDEN], preferred_element_type=jnp.float32)
           + jnp.dot(h1, fc_wt[3 * N_HIDDEN:4 * N_HIDDEN], preferred_element_type=jnp.float32)
           + fc_b_ref[...])
    final_ref[...] = prelu(fin)                                       # (1, H)


def fused_middle(*args):
    out_shape = (jax.ShapeDtypeStruct((1, N_HIDDEN), _F32),   # final_to_decode
                 jax.ShapeDtypeStruct((1, N_HIDDEN), _F32),   # h1
                 jax.ShapeDtypeStruct((1, N_HIDDEN), _F32))   # c1
    return pl.pallas_call(_mid_kernel, out_shape=out_shape)(*args)


# =============================================================================
# Kernel 3: decode (forward + inverse), grid=(2,) parallel over branches
# =============================================================================
def _decode_kernel(final_ref, a_wt_ref, a_b_ref, o1_wt_ref, o1_b_ref,
                   o2s_wt_ref, o2s_b_ref, g_act_ref, g_obj_ref,
                   action_ref, pred1_ref, pred2_ref, state_ref):
    final = final_ref[...]                                            # (1, H)

    def softmax_lanes(x):
        x = x - jnp.max(x, axis=1, keepdims=True)
        e = jnp.exp(x)
        return e / jnp.sum(e, axis=1, keepdims=True)

    logits_a = (jnp.dot(final, a_wt_ref[0], preferred_element_type=jnp.float32)
                + a_b_ref[0])                                         # (1, NREL1)
    action = softmax_lanes(logits_a)
    one_hot_a = softmax_lanes((action + g_act_ref[0]) * (1.0 / GUMBEL_TAU))

    o1_wt = o1_wt_ref[0]                                              # (H+NREL1, NOBJ)
    logits_p1 = (jnp.dot(final, o1_wt[:N_HIDDEN], preferred_element_type=jnp.float32)
                 + jnp.dot(one_hot_a, o1_wt[N_HIDDEN:], preferred_element_type=jnp.float32)
                 + o1_b_ref[0])                                       # (1, NOBJ)
    pred1 = softmax_lanes(logits_p1)
    one_hot_p1 = softmax_lanes((pred1 + g_obj_ref[0]) * (1.0 / GUMBEL_TAU))

    # obj2 and state share the same input; their weights are stacked along lanes
    o2s_wt = o2s_wt_ref[0]                                            # (H+NREL1+NOBJ, NOBJ+NSTATES)
    z = (jnp.dot(final, o2s_wt[:N_HIDDEN], preferred_element_type=jnp.float32)
         + jnp.dot(one_hot_a, o2s_wt[N_HIDDEN:N_HIDDEN + NREL1],
                   preferred_element_type=jnp.float32)
         + jnp.dot(one_hot_p1, o2s_wt[N_HIDDEN + NREL1:],
                   preferred_element_type=jnp.float32)
         + o2s_b_ref[0])                                              # (1, NOBJ+NSTATES)
    pred2 = softmax_lanes(z[:, :N_OBJECTS])
    state = softmax_lanes(z[:, N_OBJECTS:])

    action_ref[0] = action
    pred1_ref[0] = pred1
    pred2_ref[0] = pred2
    state_ref[0] = state


def fused_decode(final, a_wt, a_b, o1_wt, o1_b, o2s_wt, o2s_b, g_act, g_obj):
    h = N_HIDDEN
    out_shape = (jax.ShapeDtypeStruct((2, 1, NREL1), _F32),
                 jax.ShapeDtypeStruct((2, 1, N_OBJECTS), _F32),
                 jax.ShapeDtypeStruct((2, 1, N_OBJECTS), _F32),
                 jax.ShapeDtypeStruct((2, 1, N_STATES), _F32))
    return pl.pallas_call(
        _decode_kernel,
        grid=(2,),
        in_specs=[
            pl.BlockSpec((1, h), lambda b: (0, 0)),                                    # final (shared)
            pl.BlockSpec((1, h, NREL1), lambda b: (b, 0, 0)),                          # action W^T
            pl.BlockSpec((1, 1, NREL1), lambda b: (b, 0, 0)),                          # action b
            pl.BlockSpec((1, h + NREL1, N_OBJECTS), lambda b: (b, 0, 0)),              # obj1 W^T
            pl.BlockSpec((1, 1, N_OBJECTS), lambda b: (b, 0, 0)),                      # obj1 b
            pl.BlockSpec((1, h + NREL1 + N_OBJECTS, N_OBJECTS + N_STATES),
                         lambda b: (b, 0, 0)),                                         # obj2|state W^T
            pl.BlockSpec((1, 1, N_OBJECTS + N_STATES), lambda b: (b, 0, 0)),           # obj2|state b
            pl.BlockSpec((1, 1, NREL1), lambda b: (b, 0, 0)),                          # gumbel noise (action)
            pl.BlockSpec((1, 1, N_OBJECTS), lambda b: (b, 0, 0)),                      # gumbel noise (obj1)
        ],
        out_specs=(
            pl.BlockSpec((1, 1, NREL1), lambda b: (b, 0, 0)),
            pl.BlockSpec((1, 1, N_OBJECTS), lambda b: (b, 0, 0)),
            pl.BlockSpec((1, 1, N_OBJECTS), lambda b: (b, 0, 0)),
            pl.BlockSpec((1, 1, N_STATES), lambda b: (b, 0, 0)),
        ),
        out_shape=out_shape,
        compiler_params=pltpu.CompilerParams(dimension_semantics=("parallel",)),
    )(final, a_wt, a_b, o1_wt, o1_b, o2s_wt, o2s_b, g_act, g_obj)


# --------------------------------- glue ops -----------------------------------
def _gumbel(key, shape):
    u = jax.random.uniform(key, shape, minval=1e-6, maxval=1.0 - 1e-6)
    return -jnp.log(-jnp.log(u))


def _init_linear(key, out_f, in_f):
    k1, k2 = jax.random.split(key)
    bound = 1.0 / (in_f ** 0.5)
    w = jax.random.uniform(k1, (out_f, in_f), _F32, -bound, bound)
    b = jax.random.uniform(k2, (out_f,), _F32, -bound, bound)
    return w, b


# --------------------------------- the model ----------------------------------
class HANModelPallas:
    def __init__(self, key, in_feats=IN_FEATS, n_hidden=N_HIDDEN,
                 n_objects=N_OBJECTS, n_states=N_STATES, n_etypes=N_ETYPES):
        self.n_hidden = n_hidden
        keys = iter(jax.random.split(key, 64))

        # skip_connection (weights stored pre-transposed: (in, out))
        w, b = _init_linear(next(keys), 2, 2 * in_feats)
        self.skip_wt, self.skip_b = w.T, b.reshape(1, -1)

        # HANLayer: 1-head GATConv per meta-path (stacked) + semantic attention.
        # TODO(synk): HANLayer is not defined in the provided source; this follows
        # the canonical DGL HAN layer (GATConv + ELU per meta-path, then semantic
        # attention over meta-paths).
        gw, gal, gar, gb = [], [], [], []
        for _ in range(n_etypes):
            w, _ = _init_linear(next(keys), in_feats, in_feats)
            gw.append(w.T)
            gal.append(jax.random.normal(next(keys), (1, in_feats), _F32) * 0.1)
            gar.append(jax.random.normal(next(keys), (in_feats, 1), _F32) * 0.1)
            gb.append(jnp.zeros((1, in_feats), _F32))
        self.gat_wt = jnp.stack(gw)                   # (E, F, F)
        self.gat_al = jnp.stack(gal)                  # (E, 1, F)
        self.gat_ar = jnp.stack(gar)                  # (E, F, 1)
        self.gat_b = jnp.stack(gb)                    # (E, 1, F)
        w, b = _init_linear(next(keys), SEM_HIDDEN, in_feats)
        self.sem_w1t, self.sem_b1 = w.T, b.reshape(1, -1)
        w, _ = _init_linear(next(keys), 1, SEM_HIDDEN)
        self.sem_w2t = w.T                            # (SEM_HIDDEN, 1), bias-free

        w, b = _init_linear(next(keys), n_hidden, SBERT_VECTOR_SIZE)
        self.sbert_wt, self.sbert_b = w.T, b.reshape(1, -1)
        w, b = _init_linear(next(keys), n_hidden, PRETRAINED_VECTOR_SIZE)
        self.cnet_wt, self.cnet_b = w.T, b.reshape(1, -1)
        # graph_attn / graph_attn_gcn exist in the PyTorch module but their
        # Softmax(dim=1) output on an (N,1) tensor is identically 1.0, so the
        # forward pass never needs their values (keys consumed for parity only).
        _init_linear(next(keys), 1, in_feats + n_hidden)
        _init_linear(next(keys), 1, in_feats + n_hidden)
        w, b = _init_linear(next(keys), n_hidden, in_feats)
        self.gembed_wt, self.gembed_b = w.T, b.reshape(1, -1)
        w, b = _init_linear(next(keys), 1, 2 * n_hidden)
        self.goa_wt, self.goa_b = w.T, b.reshape(1, -1)
        w, b = _init_linear(next(keys), n_hidden, 4 * n_hidden)
        self.fc_wt, self.fc_b = w.T, b.reshape(1, -1)

        w_ih, b_ih = _init_linear(next(keys), 4 * n_hidden, LSTM_IN)
        w_hh, b_hh = _init_linear(next(keys), 4 * n_hidden, n_hidden)
        self.lstm_wih_t = w_ih.T                      # (LSTM_IN, 4H)
        self.lstm_whh_t = w_hh.T                      # (H, 4H)
        self.lstm_b = (b_ih + b_hh).reshape(1, -1)    # (1, 4H)

        # decode heads, stacked {forward, inverse} along leading axis; obj2 and
        # state stacked along the output (lane) axis so each branch is 3 matmuls.
        def head(out_f, in_f):
            w, b = _init_linear(next(keys), out_f, in_f)
            return w.T, b.reshape(1, -1)

        a_f = head(NREL1, n_hidden)
        o1_f = head(n_objects, n_hidden + NREL1)
        o2_f = head(n_objects, n_hidden + NREL1 + n_objects)
        st_f = head(n_states, n_hidden + NREL1 + n_objects)
        a_i = head(NREL1, n_hidden)
        o1_i = head(n_objects, n_hidden + NREL1)
        o2_i = head(n_objects, n_hidden + NREL1 + n_objects)
        st_i = head(n_states, n_hidden + NREL1 + n_objects)

        self.dec_a_wt = jnp.stack([a_f[0], a_i[0]])                     # (2, H, NREL1)
        self.dec_a_b = jnp.stack([a_f[1], a_i[1]])                      # (2, 1, NREL1)
        self.dec_o1_wt = jnp.stack([o1_f[0], o1_i[0]])                  # (2, H+NREL1, NOBJ)
        self.dec_o1_b = jnp.stack([o1_f[1], o1_i[1]])                   # (2, 1, NOBJ)
        self.dec_o2s_wt = jnp.stack([jnp.concatenate([o2_f[0], st_f[0]], axis=1),
                                     jnp.concatenate([o2_i[0], st_i[0]], axis=1)])
        self.dec_o2s_b = jnp.stack([jnp.concatenate([o2_f[1], st_f[1]], axis=1),
                                    jnp.concatenate([o2_i[1], st_i[1]], axis=1)])

    def __call__(self, adj, feats, goal_vec, goal_objects_vec, pred_embed, rng,
                 lstm_hidden=None):
        # ---- K1: per-etype GAT + semantic projection (grid over meta-paths) --
        z_stack, sem_scores = gat_semantic(
            feats, adj, self.gat_wt, self.gat_al, self.gat_ar, self.gat_b,
            self.sem_w1t, self.sem_b1, self.sem_w2t)
        beta = jax.nn.softmax(sem_scores.reshape(-1)).reshape(-1, 1, 1)   # glue: 5 scalars

        # ---- LSTM initial state (random if not supplied, as in the reference) -
        if lstm_hidden is None:
            kh, kc, rng = jax.random.split(rng, 3)
            h0 = jax.random.normal(kh, (1, self.n_hidden), _F32)
            c0 = jax.random.normal(kc, (1, self.n_hidden), _F32)
        else:
            h0 = lstm_hidden[0].reshape(1, self.n_hidden)
            c0 = lstm_hidden[1].reshape(1, self.n_hidden)

        # ---- K2: embeds + pooling + skip + goal-obj attention + LSTM + fc ----
        final, h1, c1 = fused_middle(
            feats, z_stack, beta,
            goal_vec.reshape(1, -1), self.sbert_wt, self.sbert_b,
            goal_objects_vec, self.cnet_wt, self.cnet_b,
            self.skip_wt, self.skip_b,
            self.gembed_wt, self.gembed_b,
            self.goa_wt, self.goa_b,
            pred_embed.reshape(1, -1), h0, c0,
            self.lstm_wih_t, self.lstm_whh_t, self.lstm_b,
            self.fc_wt, self.fc_b)
        lstm_hidden_out = (h1.reshape(1, 1, -1), c1.reshape(1, 1, -1))

        # ---- K3: forward + inverse decode on a parallel grid of 2 ------------
        k1, k2, k3, k4 = jax.random.split(rng, 4)
        g_act = jnp.stack([_gumbel(k1, (1, NREL1)), _gumbel(k3, (1, NREL1))])
        g_obj = jnp.stack([_gumbel(k2, (1, N_OBJECTS)), _gumbel(k4, (1, N_OBJECTS))])

        action, pred1, pred2, state = fused_decode(
            final, self.dec_a_wt, self.dec_a_b, self.dec_o1_wt, self.dec_o1_b,
            self.dec_o2s_wt, self.dec_o2s_b, g_act, g_obj)

        outs = (action[0, 0], pred1[0, 0], pred2[0, 0], state[0, 0],
                action[1, 0], pred1[1, 0], pred2[1, 0], state[1, 0])
        return outs, lstm_hidden_out


# ----------------------------------- main -------------------------------------
if __name__ == "__main__":
    key = jax.random.PRNGKey(0)
    k_model, k_adj, k_feat, k_goal, k_gobj, k_pred, k_fwd = jax.random.split(key, 7)

    model = HANModelPallas(k_model)

    # Synthetic heterogeneous graph: adjacency per edge-type + self loops.
    adj = (jax.random.uniform(k_adj, (N_ETYPES, N_NODES, N_NODES)) < 0.3).astype(_F32)
    adj = jnp.maximum(adj, jnp.eye(N_NODES, dtype=_F32)[None, :, :])

    feats = jax.random.normal(k_feat, (N_NODES, IN_FEATS), _F32)            # g.ndata['feat']
    goal_vec = jax.random.normal(k_goal, (SBERT_VECTOR_SIZE,), _F32)         # goalVec
    goal_objects_vec = jax.random.normal(k_gobj, (N_GOAL_OBJ, PRETRAINED_VECTOR_SIZE), _F32)
    # TODO(synk): string2embed is not defined in the provided source; use a
    # deterministic random predicate embedding of the implied width.
    pred_embed = jax.random.normal(k_pred, (LSTM_IN,), _F32)

    forward = jax.jit(
        lambda a, f, gv, gov, pe, r: model(a, f, gv, gov, pe, r))

    outs, lstm_hidden = forward(adj, feats, goal_vec, goal_objects_vec, pred_embed, k_fwd)
    outs = jax.block_until_ready(outs)
    lstm_hidden = jax.block_until_ready(lstm_hidden)

    expected = (NREL1, N_OBJECTS, N_OBJECTS, N_STATES, NREL1, N_OBJECTS, N_OBJECTS, N_STATES)
    assert tuple(int(o.shape[0]) for o in outs) == expected
    assert all(bool(jnp.all(jnp.isfinite(o))) for o in outs)
    assert lstm_hidden[0].shape == (1, 1, N_HIDDEN) and lstm_hidden[1].shape == (1, 1, N_HIDDEN)
    print("KERNEL_OK")
</pallas_src>

<mosaic_0001>
module attributes {stable_mosaic.version = 11 : i64} {
  func.func @_gat_sem_kernel(%arg0: i32, %arg1: memref<8x16xf32, #tpu.memory_space<vmem>>, %arg2: memref<1x8x8xf32, #tpu.memory_space<vmem>>, %arg3: memref<1x16x16xf32, #tpu.memory_space<vmem>>, %arg4: memref<1x1x16xf32, #tpu.memory_space<vmem>>, %arg5: memref<1x16x1xf32, #tpu.memory_space<vmem>>, %arg6: memref<1x1x16xf32, #tpu.memory_space<vmem>>, %arg7: memref<16x16xf32, #tpu.memory_space<vmem>>, %arg8: memref<1x16xf32, #tpu.memory_space<vmem>>, %arg9: memref<16x1xf32, #tpu.memory_space<vmem>>, %arg10: memref<1x8x16xf32, #tpu.memory_space<vmem>>, %arg11: memref<1x1x1xf32, #tpu.memory_space<vmem>>) attributes {dimension_semantics = [#tpu.dimension_semantics<parallel>], iteration_bounds = array<i64: 5>, scalar_prefetch = 0 : i64, scratch_operands = 0 : i64, tpu.core_type = #tpu.core_type<tc>, window_params = [{pipeline_mode = #tpu.pipeline_mode<synchronous>, transform_indices = @transform_0, window_bounds = array<i64: 8, 16>}, {transform_indices = @transform_1, window_bounds = array<i64: 1, 8, 8>}, {transform_indices = @transform_2, window_bounds = array<i64: 1, 16, 16>}, {transform_indices = @transform_3, window_bounds = array<i64: 1, 1, 16>}, {transform_indices = @transform_4, window_bounds = array<i64: 1, 16, 1>}, {transform_indices = @transform_5, window_bounds = array<i64: 1, 1, 16>}, {pipeline_mode = #tpu.pipeline_mode<synchronous>, transform_indices = @transform_6, window_bounds = array<i64: 16, 16>}, {pipeline_mode = #tpu.pipeline_mode<synchronous>, transform_indices = @transform_7, window_bounds = array<i64: 1, 16>}, {pipeline_mode = #tpu.pipeline_mode<synchronous>, transform_indices = @transform_8, window_bounds = array<i64: 16, 1>}, {transform_indices = @transform_9, window_bounds = array<i64: 1, 8, 16>}, {transform_indices = @transform_10, window_bounds = array<i64: 1, 1, 1>}]} {
    %c0 = arith.constant 0 : index
    %c0_0 = arith.constant 0 : index
    %0 = vector.load %arg1[%c0, %c0_0] : memref<8x16xf32, #tpu.memory_space<vmem>>, vector<8x16xf32>
    %c0_1 = arith.constant 0 : index
    %c0_2 = arith.constant 0 : index
    %c0_3 = arith.constant 0 : index
    %1 = vector.load %arg3[%c0_1, %c0_2, %c0_3] : memref<1x16x16xf32, #tpu.memory_space<vmem>>, vector<1x16x16xf32>
    %2 = vector.shape_cast %1 : vector<1x16x16xf32> to vector<16x16xf32>
    %cst = arith.constant dense<0.000000e+00> : vector<8x16xf32>
    %3 = tpu.matmul %0, %2, %cst {dimension_numbers = #tpu.dot_dimension_numbers<[1], [0], [0], [1], [0, 0, 1, 1], [], []>} : vector<8x16xf32>, vector<16x16xf32>, vector<8x16xf32> -> vector<8x16xf32>
    %c0_4 = arith.constant 0 : index
    %c0_5 = arith.constant 0 : index
    %c0_6 = arith.constant 0 : index
    %4 = vector.load %arg5[%c0_4, %c0_5, %c0_6] : memref<1x16x1xf32, #tpu.memory_space<vmem>>, vector<1x16x1xf32>
    %5 = vector.shape_cast %4 : vector<1x16x1xf32> to vector<16x1xf32>
    %cst_7 = arith.constant dense<0.000000e+00> : vector<8x1xf32>
    %6 = tpu.matmul %3, %5, %cst_7 {dimension_numbers = #tpu.dot_dimension_numbers<[1], [0], [0], [1], [0, 0, 1, 1], [], []>} : vector<8x16xf32>, vector<16x1xf32>, vector<8x1xf32> -> vector<8x1xf32>
    %c0_8 = arith.constant 0 : index
    %c0_9 = arith.constant 0 : index
    %c0_10 = arith.constant 0 : index
    %7 = vector.load %arg4[%c0_8, %c0_9, %c0_10] : memref<1x1x16xf32, #tpu.memory_space<vmem>>, vector<1x1x16xf32>
    %8 = vector.shape_cast %7 : vector<1x1x16xf32> to vector<1x16xf32>
    %cst_11 = arith.constant dense<0.000000e+00> : vector<1x8xf32>
    %9 = tpu.matmul %8, %3, %cst_11 {dimension_numbers = #tpu.dot_dimension_numbers<[1], [1], [0], [0], [0, 0, 1, 0], [], []>} : vector<1x16xf32>, vector<8x16xf32>, vector<1x8xf32> -> vector<1x8xf32>
    %10 = vector.broadcast %6 : vector<8x1xf32> to vector<8x8xf32>
    %11 = vector.broadcast %9 : vector<1x8xf32> to vector<8x8xf32>
    %12 = arith.addf %10, %11 : vector<8x8xf32>
    %cst_12 = arith.constant 0.000000e+00 : f32
    %13 = vector.broadcast %cst_12 : f32 to vector<8x8xf32>
    %14 = arith.cmpf oge, %12, %13 : vector<8x8xf32>
    %cst_13 = arith.constant 2.000000e-01 : f32
    %15 = vector.broadcast %cst_13 : f32 to vector<8x8xf32>
    %16 = arith.mulf %15, %12 : vector<8x8xf32>
    %17 = arith.select %14, %12, %16 : vector<8x8xi1>, vector<8x8xf32>
    %c0_14 = arith.constant 0 : index
    %c0_15 = arith.constant 0 : index
    %c0_16 = arith.constant 0 : index
    %18 = vector.load %arg2[%c0_14, %c0_15, %c0_16] : memref<1x8x8xf32, #tpu.memory_space<vmem>>, vector<1x8x8xf32>
    %19 = vector.shape_cast %18 : vector<1x8x8xf32> to vector<8x8xf32>
    %cst_17 = arith.constant 0.000000e+00 : f32
    %20 = vector.broadcast %cst_17 : f32 to vector<8x8xf32>
    %21 = arith.cmpf ogt, %19, %20 : vector<8x8xf32>
    %cst_18 = arith.constant -1.000000e+30 : f32
    %22 = vector.broadcast %cst_18 : f32 to vector<8x8xf32>
    %23 = arith.select %21, %17, %22 : vector<8x8xi1>, vector<8x8xf32>
    %cst_19 = arith.constant dense<0xFF800000> : vector<8xf32>
    %24 = vector.multi_reduction <maximumf>, %23, %cst_19 [1] : vector<8x8xf32> to vector<8xf32>
    %25 = vector.shape_cast %24 : vector<8xf32> to vector<8x1xf32>
    %26 = vector.broadcast %25 : vector<8x1xf32> to vector<8x8xf32>
    %27 = arith.subf %23, %26 : vector<8x8xf32>
    %cst_20 = arith.constant 0.000000e+00 : f32
    %28 = vector.broadcast %cst_20 : f32 to vector<8x8xf32>
    %29 = arith.cmpf ogt, %19, %28 : vector<8x8xf32>
    %30 = math.exp %27 : vector<8x8xf32>
    %cst_21 = arith.constant 0.000000e+00 : f32
    %31 = vector.broadcast %cst_21 : f32 to vector<8x8xf32>
    %32 = arith.select %29, %30, %31 : vector<8x8xi1>, vector<8x8xf32>
    %cst_22 = arith.constant dense<0.000000e+00> : vector<8xf32>
    %33 = vector.multi_reduction <add>, %32, %cst_22 [1] : vector<8x8xf32> to vector<8xf32>
    %34 = vector.shape_cast %33 : vector<8xf32> to vector<8x1xf32>
    %cst_23 = arith.constant 1.000000e-30 : f32
    %35 = vector.broadcast %cst_23 : f32 to vector<8x1xf32>
    %36 = arith.maximumf %34, %35 : vector<8x1xf32>
    %37 = vector.broadcast %36 : vector<8x1xf32> to vector<8x8xf32>
    %38 = arith.divf %32, %37 : vector<8x8xf32>
    %cst_24 = arith.constant dense<0.000000e+00> : vector<8x16xf32>
    %39 = tpu.matmul %38, %3, %cst_24 {dimension_numbers = #tpu.dot_dimension_numbers<[1], [0], [0], [1], [0, 0, 1, 1], [], []>} : vector<8x8xf32>, vector<8x16xf32>, vector<8x16xf32> -> vector<8x16xf32>
    %c0_25 = arith.constant 0 : index
    %c0_26 = arith.constant 0 : index
    %c0_27 = arith.constant 0 : index
    %40 = vector.load %arg6[%c0_25, %c0_26, %c0_27] : memref<1x1x16xf32, #tpu.memory_space<vmem>>, vector<1x1x16xf32>
    %41 = vector.shape_cast %40 : vector<1x1x16xf32> to vector<1x16xf32>
    %42 = vector.broadcast %41 : vector<1x16xf32> to vector<8x16xf32>
    %43 = arith.addf %39, %42 : vector<8x16xf32>
    %cst_28 = arith.constant 0.000000e+00 : f32
    %44 = vector.broadcast %cst_28 : f32 to vector<8x16xf32>
    %45 = arith.cmpf ogt, %43, %44 : vector<8x16xf32>
    %cst_29 = arith.constant 0.000000e+00 : f32
    %46 = vector.broadcast %cst_29 : f32 to vector<8x16xf32>
    %47 = arith.minimumf %43, %46 : vector<8x16xf32>
    %48 = math.exp %47 : vector<8x16xf32>
    %cst_30 = arith.constant 1.000000e+00 : f32
    %49 = vector.broadcast %cst_30 : f32 to vector<8x16xf32>
    %50 = arith.subf %48, %49 : vector<8x16xf32>
    %51 = arith.select %45, %43, %50 : vector<8x16xi1>, vector<8x16xf32>
    %c0_31 = arith.constant 0 : index
    %c0_32 = arith.constant 0 : index
    %c0_33 = arith.constant 0 : index
    %52 = vector.load %arg10[%c0_31, %c0_32, %c0_33] : memref<1x8x16xf32, #tpu.memory_space<vmem>>, vector<1x8x16xf32>
    %53 = vector.shape_cast %52 : vector<1x8x16xf32> to vector<8x16xf32>
    %54 = vector.shape_cast %51 : vector<8x16xf32> to vector<1x8x16xf32>
    tpu.vector_store %arg10[%c0_31, %c0_32, %c0_33], %54 {strides = array<i32>} : memref<1x8x16xf32, #tpu.memory_space<vmem>>, vector<1x8x16xf32>,
    %c0_34 = arith.constant 0 : index
    %c0_35 = arith.constant 0 : index
    %55 = vector.load %arg7[%c0_34, %c0_35] : memref<16x16xf32, #tpu.memory_space<vmem>>, vector<16x16xf32>
    %cst_36 = arith.constant dense<0.000000e+00> : vector<8x16xf32>
    %56 = tpu.matmul %51, %55, %cst_36 {dimension_numbers = #tpu.dot_dimension_numbers<[1], [0], [0], [1], [0, 0, 1, 1], [], []>} : vector<8x16xf32>, vector<16x16xf32>, vector<8x16xf32> -> vector<8x16xf32>
    %c0_37 = arith.constant 0 : index
    %c0_38 = arith.constant 0 : index
    %57 = vector.load %arg8[%c0_37, %c0_38] : memref<1x16xf32, #tpu.memory_space<vmem>>, vector<1x16xf32>
    %58 = vector.broadcast %57 : vector<1x16xf32> to vector<8x16xf32>
    %59 = arith.addf %56, %58 : vector<8x16xf32>
    %60 = math.tanh %59 : vector<8x16xf32>
    %c0_39 = arith.constant 0 : index
    %c0_40 = arith.constant 0 : index
    %61 = vector.load %arg9[%c0_39, %c0_40] : memref<16x1xf32, #tpu.memory_space<vmem>>, vector<16x1xf32>
    %cst_41 = arith.constant dense<0.000000e+00> : vector<8x1xf32>
    %62 = tpu.matmul %60, %61, %cst_41 {dimension_numbers = #tpu.dot_dimension_numbers<[1], [0], [0], [1], [0, 0, 1, 1], [], []>} : vector<8x16xf32>, vector<16x1xf32>, vector<8x1xf32> -> vector<8x1xf32>
    %63 = vector.shape_cast %62 : vector<8x1xf32> to vector<1x8x1xf32>
    %cst_42 = arith.constant dense<0.000000e+00> : vector<1xf32>
    %64 = vector.multi_reduction <add>, %63, %cst_42 [1, 2] : vector<1x8x1xf32> to vector<1xf32>
    %65 = vector.shape_cast %64 : vector<1xf32> to vector<1x1x1xf32>
    %66 = vector.extract %65[0, 0, 0] : f32 from vector<1x1x1xf32>
    %67 = vector.broadcast %66 : f32 to vector<1x1xf32>
    %cst_43 = arith.constant 8.000000e+00 : f32
    %68 = vector.broadcast %cst_43 : f32 to vector<1x1xf32>
    %69 = arith.divf %67, %68 : vector<1x1xf32>
    %c0_44 = arith.constant 0 : index
    %c0_45 = arith.constant 0 : index
    %c0_46 = arith.constant 0 : index
    %70 = vector.load %arg11[%c0_44, %c0_45, %c0_46] : memref<1x1x1xf32, #tpu.memory_space<vmem>>, vector<1x1x1xf32>
    %71 = vector.shape_cast %70 : vector<1x1x1xf32> to vector<1x1xf32>
    %72 = vector.shape_cast %69 : vector<1x1xf32> to vector<1x1x1xf32>
    tpu.vector_store %arg11[%c0_44, %c0_45, %c0_46], %72 {strides = array<i32>} : memref<1x1x1xf32, #tpu.memory_space<vmem>>, vector<1x1x1xf32>,
    return
  }
  func.func @transform_0(%arg0: i32) -> (i32, i32) {
    %c0_i32 = arith.constant 0 : i32
    %c0_i32_0 = arith.constant 0 : i32
    %c0_i32_1 = arith.constant 0 : i32
    return %c0_i32, %c0_i32_0 : i32, i32
  }
  func.func @transform_1(%arg0: i32) -> (i32, i32, i32) {
    %c0_i32 = arith.constant 0 : i32
    %c0_i32_0 = arith.constant 0 : i32
    %c0_i32_1 = arith.constant 0 : i32
    return %arg0, %c0_i32, %c0_i32_0 : i32, i32, i32
  }
  func.func @transform_2(%arg0: i32) -> (i32, i32, i32) {
    %c0_i32 = arith.constant 0 : i32
    %c0_i32_0 = arith.constant 0 : i32
    %c0_i32_1 = arith.constant 0 : i32
    return %arg0, %c0_i32, %c0_i32_0 : i32, i32, i32
  }
  func.func @transform_3(%arg0: i32) -> (i32, i32, i32) {
    %c0_i32 = arith.constant 0 : i32
    %c0_i32_0 = arith.constant 0 : i32
    %c0_i32_1 = arith.constant 0 : i32
    return %arg0, %c0_i32, %c0_i32_0 : i32, i32, i32
  }
  func.func @transform_4(%arg0: i32) -> (i32, i32, i32) {
    %c0_i32 = arith.constant 0 : i32
    %c0_i32_0 = arith.constant 0 : i32
    %c0_i32_1 = arith.constant 0 : i32
    return %arg0, %c0_i32, %c0_i32_0 : i32, i32, i32
  }
  func.func @transform_5(%arg0: i32) -> (i32, i32, i32) {
    %c0_i32 = arith.constant 0 : i32
    %c0_i32_0 = arith.constant 0 : i32
    %c0_i32_1 = arith.constant 0 : i32
    return %arg0, %c0_i32, %c0_i32_0 : i32, i32, i32
  }
  func.func @transform_6(%arg0: i32) -> (i32, i32) {
    %c0_i32 = arith.constant 0 : i32
    %c0_i32_0 = arith.constant 0 : i32
    %c0_i32_1 = arith.constant 0 : i32
    return %c0_i32, %c0_i32_0 : i32, i32
  }
  func.func @transform_7(%arg0: i32) -> (i32, i32) {
    %c0_i32 = arith.constant 0 : i32
    %c0_i32_0 = arith.constant 0 : i32
    %c0_i32_1 = arith.constant 0 : i32
    return %c0_i32, %c0_i32_0 : i32, i32
  }
  func.func @transform_8(%arg0: i32) -> (i32, i32) {
    %c0_i32 = arith.constant 0 : i32
    %c0_i32_0 = arith.constant 0 : i32
    %c0_i32_1 = arith.constant 0 : i32
    return %c0_i32, %c0_i32_0 : i32, i32
  }
  func.func @transform_9(%arg0: i32) -> (i32, i32, i32) {
    %c0_i32 = arith.constant 0 : i32
    %c0_i32_0 = arith.constant 0 : i32
    %c0_i32_1 = arith.constant 0 : i32
    return %arg0, %c0_i32, %c0_i32_0 : i32, i32, i32
  }
  func.func @transform_10(%arg0: i32) -> (i32, i32, i32) {
    %c0_i32 = arith.constant 0 : i32
    %c0_i32_0 = arith.constant 0 : i32
    %c0_i32_1 = arith.constant 0 : i32
    return %arg0, %c0_i32, %c0_i32_0 : i32, i32, i32
  }
}

module attributes {stable_mosaic.version = 11 : i64} {
  func.func @_mid_kernel(%arg0: memref<8x16xf32, #tpu.memory_space<vmem>>, %arg1: memref<5x8x16xf32, #tpu.memory_space<vmem>>, %arg2: memref<5x1x1xf32, #tpu.memory_space<vmem>>, %arg3: memref<1x48xf32, #tpu.memory_space<vmem>>, %arg4: memref<48x32xf32, #tpu.memory_space<vmem>>, %arg5: memref<1x32xf32, #tpu.memory_space<vmem>>, %arg6: memref<3x24xf32, #tpu.memory_space<vmem>>, %arg7: memref<24x32xf32, #tpu.memory_space<vmem>>, %arg8: memref<1x32xf32, #tpu.memory_space<vmem>>, %arg9: memref<32x2xf32, #tpu.memory_space<vmem>>, %arg10: memref<1x2xf32, #tpu.memory_space<vmem>>, %arg11: memref<16x32xf32, #tpu.memory_space<vmem>>, %arg12: memref<1x32xf32, #tpu.memory_space<vmem>>, %arg13: memref<64x1xf32, #tpu.memory_space<vmem>>, %arg14: memref<1x1xf32, #tpu.memory_space<vmem>>, %arg15: memref<1x56xf32, #tpu.memory_space<vmem>>, %arg16: memref<1x32xf32, #tpu.memory_space<vmem>>, %arg17: memref<1x32xf32, #tpu.memory_space<vmem>>, %arg18: memref<56x128xf32, #tpu.memory_space<vmem>>, %arg19: memref<32x128xf32, #tpu.memory_space<vmem>>, %arg20: memref<1x128xf32, #tpu.memory_space<vmem>>, %arg21: memref<128x32xf32, #tpu.memory_space<vmem>>, %arg22: memref<1x32xf32, #tpu.memory_space<vmem>>, %arg23: memref<1x32xf32, #tpu.memory_space<vmem>>, %arg24: memref<1x32xf32, #tpu.memory_space<vmem>>, %arg25: memref<1x32xf32, #tpu.memory_space<vmem>>) attributes {dimension_semantics = [], scalar_prefetch = 0 : i64, scratch_operands = 0 : i64, tpu.core_type = #tpu.core_type<tc>} {
    %c0 = arith.constant 0 : index
    %c0_0 = arith.constant 0 : index
    %0 = vector.load %arg0[%c0, %c0_0] : memref<8x16xf32, #tpu.memory_space<vmem>>, vector<8x16xf32>
    %c0_1 = arith.constant 0 : index
    %c0_2 = arith.constant 0 : index
    %c0_3 = arith.constant 0 : index
    %1 = vector.load %arg2[%c0_1, %c0_2, %c0_3] : memref<5x1x1xf32, #tpu.memory_space<vmem>>, vector<1x1x1xf32>
    %2 = vector.shape_cast %1 : vector<1x1x1xf32> to vector<1x1xf32>
    %c0_4 = arith.constant 0 : index
    %c0_5 = arith.constant 0 : index
    %c0_6 = arith.constant 0 : index
    %3 = vector.load %arg1[%c0_4, %c0_5, %c0_6] : memref<5x8x16xf32, #tpu.memory_space<vmem>>, vector<1x8x16xf32>
    %4 = vector.shape_cast %3 : vector<1x8x16xf32> to vector<8x16xf32>
    %5 = vector.broadcast %2 : vector<1x1xf32> to vector<8x16xf32>
    %6 = arith.mulf %5, %4 : vector<8x16xf32>
    %c1 = arith.constant 1 : index
    %c0_7 = arith.constant 0 : index
    %c0_8 = arith.constant 0 : index
    %7 = vector.load %arg2[%c1, %c0_7, %c0_8] : memref<5x1x1xf32, #tpu.memory_space<vmem>>, vector<1x1x1xf32>
    %8 = vector.shape_cast %7 : vector<1x1x1xf32> to vector<1x1xf32>
    %c1_9 = arith.constant 1 : index
    %c0_10 = arith.constant 0 : index
    %c0_11 = arith.constant 0 : index
    %9 = vector.load %arg1[%c1_9, %c0_10, %c0_11] : memref<5x8x16xf32, #tpu.memory_space<vmem>>, vector<1x8x16xf32>
    %10 = vector.shape_cast %9 : vector<1x8x16xf32> to vector<8x16xf32>
    %11 = vector.broadcast %8 : vector<1x1xf32> to vector<8x16xf32>
    %12 = arith.mulf %11, %10 : vector<8x16xf32>
    %13 = arith.addf %6, %12 : vector<8x16xf32>
    %c2 = arith.constant 2 : index
    %c0_12 = arith.constant 0 : index
    %c0_13 = arith.constant 0 : index
    %14 = vector.load %arg2[%c2, %c0_12, %c0_13] : memref<5x1x1xf32, #tpu.memory_space<vmem>>, vector<1x1x1xf32>
    %15 = vector.shape_cast %14 : vector<1x1x1xf32> to vector<1x1xf32>
    %c2_14 = arith.constant 2 : index
    %c0_15 = arith.constant 0 : index
    %c0_16 = arith.constant 0 : index
    %16 = vector.load %arg1[%c2_14, %c0_15, %c0_16] : memref<5x8x16xf32, #tpu.memory_space<vmem>>, vector<1x8x16xf32>
    %17 = vector.shape_cast %16 : vector<1x8x16xf32> to vector<8x16xf32>
    %18 = vector.broadcast %15 : vector<1x1xf32> to vector<8x16xf32>
    %19 = arith.mulf %18, %17 : vector<8x16xf32>
    %20 = arith.addf %13, %19 : vector<8x16xf32>
    %c3 = arith.constant 3 : index
    %c0_17 = arith.constant 0 : index
    %c0_18 = arith.constant 0 : index
    %21 = vector.load %arg2[%c3, %c0_17, %c0_18] : memref<5x1x1xf32, #tpu.memory_space<vmem>>, vector<1x1x1xf32>
    %22 = vector.shape_cast %21 : vector<1x1x1xf32> to vector<1x1xf32>
    %c3_19 = arith.constant 3 : index
    %c0_20 = arith.constant 0 : index
    %c0_21 = arith.constant 0 : index
    %23 = vector.load %arg1[%c3_19, %c0_20, %c0_21] : memref<5x8x16xf32, #tpu.memory_space<vmem>>, vector<1x8x16xf32>
    %24 = vector.shape_cast %23 : vector<1x8x16xf32> to vector<8x16xf32>
    %25 = vector.broadcast %22 : vector<1x1xf32> to vector<8x16xf32>
    %26 = arith.mulf %25, %24 : vector<8x16xf32>
    %27 = arith.addf %20, %26 : vector<8x16xf32>
    %c4 = arith.constant 4 : index
    %c0_22 = arith.constant 0 : index
    %c0_23 = arith.constant 0 : index
    %28 = vector.load %arg2[%c4, %c0_22, %c0_23] : memref<5x1x1xf32, #tpu.memory_space<vmem>>, vector<1x1x1xf32>
    %29 = vector.shape_cast %28 : vector<1x1x1xf32> to vector<1x1xf32>
    %c4_24 = arith.constant 4 : index
    %c0_25 = arith.constant 0 : index
    %c0_26 = arith.constant 0 : index
    %30 = vector.load %arg1[%c4_24, %c0_25, %c0_26] : memref<5x8x16xf32, #tpu.memory_space<vmem>>, vector<1x8x16xf32>
    %31 = vector.shape_cast %30 : vector<1x8x16xf32> to vector<8x16xf32>
    %32 = vector.broadcast %29 : vector<1x1xf32> to vector<8x16xf32>
    %33 = arith.mulf %32, %31 : vector<8x16xf32>
    %34 = arith.addf %27, %33 : vector<8x16xf32>
    %cst = arith.constant dense<0.000000e+00> : vector<16xf32>
    %35 = vector.multi_reduction <add>, %0, %cst [0] : vector<8x16xf32> to vector<16xf32>
    %36 = vector.shape_cast %35 : vector<16xf32> to vector<1x16xf32>
    %cst_27 = arith.constant dense<0.000000e+00> : vector<16xf32>
    %37 = vector.multi_reduction <add>, %34, %cst_27 [0] : vector<8x16xf32> to vector<16xf32>
    %38 = vector.shape_cast %37 : vector<16xf32> to vector<1x16xf32>
    %c0_28 = arith.constant 0 : index
    %c0_29 = arith.constant 0 : index
    %39 = vector.load %arg9[%c0_28, %c0_29] : memref<32x2xf32, #tpu.memory_space<vmem>>, vector<32x2xf32>
    %40 = vector.extract_strided_slice %39 {offsets = [0, 0], sizes = [16, 2], strides = [1, 1]} : vector<32x2xf32> to vector<16x2xf32>
    %cst_30 = arith.constant dense<0.000000e+00> : vector<1x2xf32>
    %41 = tpu.matmul %36, %40, %cst_30 {dimension_numbers = #tpu.dot_dimension_numbers<[1], [0], [0], [1], [0, 0, 1, 1], [], []>} : vector<1x16xf32>, vector<16x2xf32>, vector<1x2xf32> -> vector<1x2xf32>
    %42 = vector.extract_strided_slice %39 {offsets = [16, 0], sizes = [16, 2], strides = [1, 1]} : vector<32x2xf32> to vector<16x2xf32>
    %cst_31 = arith.constant dense<0.000000e+00> : vector<1x2xf32>
    %43 = tpu.matmul %38, %42, %cst_31 {dimension_numbers = #tpu.dot_dimension_numbers<[1], [0], [0], [1], [0, 0, 1, 1], [], []>} : vector<1x16xf32>, vector<16x2xf32>, vector<1x2xf32> -> vector<1x2xf32>
    %44 = arith.addf %41, %43 : vector<1x2xf32>
    %c0_32 = arith.constant 0 : index
    %c0_33 = arith.constant 0 : index
    %45 = vector.load %arg10[%c0_32, %c0_33] : memref<1x2xf32, #tpu.memory_space<vmem>>, vector<1x2xf32>
    %46 = arith.addf %44, %45 : vector<1x2xf32>
    %cst_34 = arith.constant dense<0xFF800000> : vector<1xf32>
    %47 = vector.multi_reduction <maximumf>, %46, %cst_34 [1] : vector<1x2xf32> to vector<1xf32>
    %48 = vector.shape_cast %47 : vector<1xf32> to vector<1x1xf32>
    %49 = vector.broadcast %48 : vector<1x1xf32> to vector<1x2xf32>
    %50 = arith.subf %46, %49 : vector<1x2xf32>
    %51 = math.exp %50 : vector<1x2xf32>
    %cst_35 = arith.constant dense<0.000000e+00> : vector<1xf32>
    %52 = vector.multi_reduction <add>, %51, %cst_35 [1] : vector<1x2xf32> to vector<1xf32>
    %53 = vector.shape_cast %52 : vector<1xf32> to vector<1x1xf32>
    %54 = vector.broadcast %53 : vector<1x1xf32> to vector<1x2xf32>
    %55 = arith.divf %51, %54 : vector<1x2xf32>
    %56 = vector.extract_strided_slice %55 {offsets = [0, 0], sizes = [1, 1], strides = [1, 1]} : vector<1x2xf32> to vector<1x1xf32>
    %57 = vector.broadcast %56 : vector<1x1xf32> to vector<1x16xf32>
    %58 = arith.mulf %57, %36 : vector<1x16xf32>
    %59 = vector.extract_strided_slice %55 {offsets = [0, 1], sizes = [1, 1], strides = [1, 1]} : vector<1x2xf32> to vector<1x1xf32>
    %60 = vector.broadcast %59 : vector<1x1xf32> to vector<1x16xf32>
    %61 = arith.mulf %60, %38 : vector<1x16xf32>
    %62 = arith.addf %58, %61 : vector<1x16xf32>
    %c0_36 = arith.constant 0 : index
    %c0_37 = arith.constant 0 : index
    %63 = vector.load %arg3[%c0_36, %c0_37] : memref<1x48xf32, #tpu.memory_space<vmem>>, vector<1x48xf32>
    %c0_38 = arith.constant 0 : index
    %c0_39 = arith.constant 0 : index
    %64 = vector.load %arg4[%c0_38, %c0_39] : memref<48x32xf32, #tpu.memory_space<vmem>>, vector<48x32xf32>
    %cst_40 = arith.constant dense<0.000000e+00> : vector<1x32xf32>
    %65 = tpu.matmul %63, %64, %cst_40 {dimension_numbers = #tpu.dot_dimension_numbers<[1], [0], [0], [1], [0, 0, 1, 1], [], []>} : vector<1x48xf32>, vector<48x32xf32>, vector<1x32xf32> -> vector<1x32xf32>
    %c0_41 = arith.constant 0 : index
    %c0_42 = arith.constant 0 : index
    %66 = vector.load %arg5[%c0_41, %c0_42] : memref<1x32xf32, #tpu.memory_space<vmem>>, vector<1x32xf32>
    %67 = arith.addf %65, %66 : vector<1x32xf32>
    %cst_43 = arith.constant 0.000000e+00 : f32
    %68 = vector.broadcast %cst_43 : f32 to vector<1x32xf32>
    %69 = arith.cmpf oge, %67, %68 : vector<1x32xf32>
    %cst_44 = arith.constant 2.500000e-01 : f32
    %70 = vector.broadcast %cst_44 : f32 to vector<1x32xf32>
    %71 = arith.mulf %70, %67 : vector<1x32xf32>
    %72 = arith.select %69, %67, %71 : vector<1x32xi1>, vector<1x32xf32>
    %c0_45 = arith.constant 0 : index
    %c0_46 = arith.constant 0 : index
    %73 = vector.load %arg11[%c0_45, %c0_46] : memref<16x32xf32, #tpu.memory_space<vmem>>, vector<16x32xf32>
    %cst_47 = arith.constant dense<0.000000e+00> : vector<1x32xf32>
    %74 = tpu.matmul %62, %73, %cst_47 {dimension_numbers = #tpu.dot_dimension_numbers<[1], [0], [0], [1], [0, 0, 1, 1], [], []>} : vector<1x16xf32>, vector<16x32xf32>, vector<1x32xf32> -> vector<1x32xf32>
    %c0_48 = arith.constant 0 : index
    %c0_49 = arith.constant 0 : index
    %75 = vector.load %arg12[%c0_48, %c0_49] : memref<1x32xf32, #tpu.memory_space<vmem>>, vector<1x32xf32>
    %76 = arith.addf %74, %75 : vector<1x32xf32>
    %cst_50 = arith.constant 0.000000e+00 : f32
    %77 = vector.broadcast %cst_50 : f32 to vector<1x32xf32>
    %78 = arith.cmpf oge, %76, %77 : vector<1x32xf32>
    %cst_51 = arith.constant 2.500000e-01 : f32
    %79 = vector.broadcast %cst_51 : f32 to vector<1x32xf32>
    %80 = arith.mulf %79, %76 : vector<1x32xf32>
    %81 = arith.select %78, %76, %80 : vector<1x32xi1>, vector<1x32xf32>
    %c0_52 = arith.constant 0 : index
    %c0_53 = arith.constant 0 : index
    %82 = vector.load %arg6[%c0_52, %c0_53] : memref<3x24xf32, #tpu.memory_space<vmem>>, vector<3x24xf32>
    %c0_54 = arith.constant 0 : index
    %c0_55 = arith.constant 0 : index
    %83 = vector.load %arg7[%c0_54, %c0_55] : memref<24x32xf32, #tpu.memory_space<vmem>>, vector<24x32xf32>
    %cst_56 = arith.constant dense<0.000000e+00> : vector<3x32xf32>
    %84 = tpu.matmul %82, %83, %cst_56 {dimension_numbers = #tpu.dot_dimension_numbers<[1], [0], [0], [1], [0, 0, 1, 1], [], []>} : vector<3x24xf32>, vector<24x32xf32>, vector<3x32xf32> -> vector<3x32xf32>
    %c0_57 = arith.constant 0 : index
    %c0_58 = arith.constant 0 : index
    %85 = vector.load %arg8[%c0_57, %c0_58] : memref<1x32xf32, #tpu.memory_space<vmem>>, vector<1x32xf32>
    %86 = vector.broadcast %85 : vector<1x32xf32> to vector<3x32xf32>
    %87 = arith.addf %84, %86 : vector<3x32xf32>
    %cst_59 = arith.constant 0.000000e+00 : f32
    %88 = vector.broadcast %cst_59 : f32 to vector<3x32xf32>
    %89 = arith.cmpf oge, %87, %88 : vector<3x32xf32>
    %cst_60 = arith.constant 2.500000e-01 : f32
    %90 = vector.broadcast %cst_60 : f32 to vector<3x32xf32>
    %91 = arith.mulf %90, %87 : vector<3x32xf32>
    %92 = arith.select %89, %87, %91 : vector<3x32xi1>, vector<3x32xf32>
    %c0_61 = arith.constant 0 : index
    %c0_62 = arith.constant 0 : index
    %93 = vector.load %arg13[%c0_61, %c0_62] : memref<64x1xf32, #tpu.memory_space<vmem>>, vector<64x1xf32>
    %94 = vector.extract_strided_slice %93 {offsets = [0, 0], sizes = [32, 1], strides = [1, 1]} : vector<64x1xf32> to vector<32x1xf32>
    %cst_63 = arith.constant dense<0.000000e+00> : vector<1x1xf32>
    %95 = tpu.matmul %81, %94, %cst_63 {dimension_numbers = #tpu.dot_dimension_numbers<[1], [0], [0], [1], [0, 0, 1, 1], [], []>} : vector<1x32xf32>, vector<32x1xf32>, vector<1x1xf32> -> vector<1x1xf32>
    %96 = vector.extract_strided_slice %93 {offsets = [32, 0], sizes = [32, 1], strides = [1, 1]} : vector<64x1xf32> to vector<32x1xf32>
    %cst_64 = arith.constant dense<0.000000e+00> : vector<3x1xf32>
    %97 = tpu.matmul %92, %96, %cst_64 {dimension_numbers = #tpu.dot_dimension_numbers<[1], [0], [0], [1], [0, 0, 1, 1], [], []>} : vector<3x32xf32>, vector<32x1xf32>, vector<3x1xf32> -> vector<3x1xf32>
    %98 = vector.broadcast %95 : vector<1x1xf32> to vector<3x1xf32>
    %99 = arith.addf %98, %97 : vector<3x1xf32>
    %c0_65 = arith.constant 0 : index
    %c0_66 = arith.constant 0 : index
    %100 = vector.load %arg14[%c0_65, %c0_66] : memref<1x1xf32, #tpu.memory_space<vmem>>, vector<1x1xf32>
    %101 = vector.broadcast %100 : vector<1x1xf32> to vector<3x1xf32>
    %102 = arith.addf %99, %101 : vector<3x1xf32>
    %cst_67 = arith.constant dense<0xFF800000> : vector<1xf32>
    %103 = vector.multi_reduction <maximumf>, %102, %cst_67 [0] : vector<3x1xf32> to vector<1xf32>
    %104 = vector.shape_cast %103 : vector<1xf32> to vector<1x1xf32>
    %105 = vector.broadcast %104 : vector<1x1xf32> to vector<3x1xf32>
    %106 = arith.subf %102, %105 : vector<3x1xf32>
    %107 = math.exp %106 : vector<3x1xf32>
    %cst_68 = arith.constant dense<0.000000e+00> : vector<1xf32>
    %108 = vector.multi_reduction <add>, %107, %cst_68 [0] : vector<3x1xf32> to vector<1xf32>
    %109 = vector.shape_cast %108 : vector<1xf32> to vector<1x1xf32>
    %110 = vector.broadcast %109 : vector<1x1xf32> to vector<3x1xf32>
    %111 = arith.divf %107, %110 : vector<3x1xf32>
    %cst_69 = arith.constant dense<0.000000e+00> : vector<1x32xf32>
    %112 = tpu.matmul %111, %92, %cst_69 {dimension_numbers = #tpu.dot_dimension_numbers<[0], [0], [1], [1], [0, 1, 1, 1], [], []>} : vector<3x1xf32>, vector<3x32xf32>, vector<1x32xf32> -> vector<1x32xf32>
    %c0_70 = arith.constant 0 : index
    %c0_71 = arith.constant 0 : index
    %113 = vector.load %arg15[%c0_70, %c0_71] : memref<1x56xf32, #tpu.memory_space<vmem>>, vector<1x56xf32>
    %c0_72 = arith.constant 0 : index
    %c0_73 = arith.constant 0 : index
    %114 = vector.load %arg18[%c0_72, %c0_73] : memref<56x128xf32, #tpu.memory_space<vmem>>, vector<56x128xf32>
    %cst_74 = arith.constant dense<0.000000e+00> : vector<1x128xf32>
    %115 = tpu.matmul %113, %114, %cst_74 {dimension_numbers = #tpu.dot_dimension_numbers<[1], [0], [0], [1], [0, 0, 1, 1], [], []>} : vector<1x56xf32>, vector<56x128xf32>, vector<1x128xf32> -> vector<1x128xf32>
    %c0_75 = arith.constant 0 : index
    %c0_76 = arith.constant 0 : index
    %116 = vector.load %arg16[%c0_75, %c0_76] : memref<1x32xf32, #tpu.memory_space<vmem>>, vector<1x32xf32>
    %c0_77 = arith.constant 0 : index
    %c0_78 = arith.constant 0 : index
    %117 = vector.load %arg19[%c0_77, %c0_78] : memref<32x128xf32, #tpu.memory_space<vmem>>, vector<32x128xf32>
    %cst_79 = arith.constant dense<0.000000e+00> : vector<1x128xf32>
    %118 = tpu.matmul %116, %117, %cst_79 {dimension_numbers = #tpu.dot_dimension_numbers<[1], [0], [0], [1], [0, 0, 1, 1], [], []>} : vector<1x32xf32>, vector<32x128xf32>, vector<1x128xf32> -> vector<1x128xf32>
    %119 = arith.addf %115, %118 : vector<1x128xf32>
    %c0_80 = arith.constant 0 : index
    %c0_81 = arith.constant 0 : index
    %120 = vector.load %arg20[%c0_80, %c0_81] : memref<1x128xf32, #tpu.memory_space<vmem>>, vector<1x128xf32>
    %121 = arith.addf %119, %120 : vector<1x128xf32>
    %122 = vector.extract_strided_slice %121 {offsets = [0, 0], sizes = [1, 32], strides = [1, 1]} : vector<1x128xf32> to vector<1x32xf32>
    %123 = arith.negf %122 : vector<1x32xf32>
    %124 = math.exp %123 : vector<1x32xf32>
    %cst_82 = arith.constant 1.000000e+00 : f32
    %125 = vector.broadcast %cst_82 : f32 to vector<1x32xf32>
    %126 = arith.addf %125, %124 : vector<1x32xf32>
    %127 = arith.divf %125, %126 : vector<1x32xf32>
    %128 = vector.extract_strided_slice %121 {offsets = [0, 32], sizes = [1, 32], strides = [1, 1]} : vector<1x128xf32> to vector<1x32xf32>
    %129 = arith.negf %128 : vector<1x32xf32>
    %130 = math.exp %129 : vector<1x32xf32>
    %cst_83 = arith.constant 1.000000e+00 : f32
    %131 = vector.broadcast %cst_83 : f32 to vector<1x32xf32>
    %132 = arith.addf %131, %130 : vector<1x32xf32>
    %133 = arith.divf %131, %132 : vector<1x32xf32>
    %134 = vector.extract_strided_slice %121 {offsets = [0, 64], sizes = [1, 32], strides = [1, 1]} : vector<1x128xf32> to vector<1x32xf32>
    %135 = math.tanh %134 : vector<1x32xf32>
    %136 = vector.extract_strided_slice %121 {offsets = [0, 96], sizes = [1, 32], strides = [1, 1]} : vector<1x128xf32> to vector<1x32xf32>
    %137 = arith.negf %136 : vector<1x32xf32>
    %138 = math.exp %137 : vector<1x32xf32>
    %cst_84 = arith.constant 1.000000e+00 : f32
    %139 = vector.broadcast %cst_84 : f32 to vector<1x32xf32>
    %140 = arith.addf %139, %138 : vector<1x32xf32>
    %141 = arith.divf %139, %140 : vector<1x32xf32>
    %c0_85 = arith.constant 0 : index
    %c0_86 = arith.constant 0 : index
    %142 = vector.load %arg17[%c0_85, %c0_86] : memref<1x32xf32, #tpu.memory_space<vmem>>, vector<1x32xf32>
    %143 = arith.mulf %133, %142 : vector<1x32xf32>
    %144 = arith.mulf %127, %135 : vector<1x32xf32>
    %145 = arith.addf %143, %144 : vector<1x32xf32>
    %146 = math.tanh %145 : vector<1x32xf32>
    %147 = arith.mulf %141, %146 : vector<1x32xf32>
    %c0_87 = arith.constant 0 : index
    %c0_88 = arith.constant 0 : index
    %148 = vector.load %arg24[%c0_87, %c0_88] : memref<1x32xf32, #tpu.memory_space<vmem>>, vector<1x32xf32>
    tpu.vector_store %arg24[%c0_87, %c0_88], %147 {strides = array<i32>} : memref<1x32xf32, #tpu.memory_space<vmem>>, vector<1x32xf32>,
    %c0_89 = arith.constant 0 : index
    %c0_90 = arith.constant 0 : index
    %149 = vector.load %arg25[%c0_89, %c0_90] : memref<1x32xf32, #tpu.memory_space<vmem>>, vector<1x32xf32>
    tpu.vector_store %arg25[%c0_89, %c0_90], %145 {strides = array<i32>} : memref<1x32xf32, #tpu.memory_space<vmem>>, vector<1x32xf32>,
    %c0_91 = arith.constant 0 : index
    %c0_92 = arith.constant 0 : index
    %150 = vector.load %arg21[%c0_91, %c0_92] : memref<128x32xf32, #tpu.memory_space<vmem>>, vector<128x32xf32>
    %151 = vector.extract_strided_slice %150 {offsets = [0, 0], sizes = [32, 32], strides = [1, 1]} : vector<128x32xf32> to vector<32x32xf32>
    %cst_93 = arith.constant dense<0.000000e+00> : vector<1x32xf32>
    %152 = tpu.matmul %81, %151, %cst_93 {dimension_numbers = #tpu.dot_dimension_numbers<[1], [0], [0], [1], [0, 0, 1, 1], [], []>} : vector<1x32xf32>, vector<32x32xf32>, vector<1x32xf32> -> vector<1x32xf32>
    %153 = vector.extract_strided_slice %150 {offsets = [32, 0], sizes = [32, 32], strides = [1, 1]} : vector<128x32xf32> to vector<32x32xf32>
    %cst_94 = arith.constant dense<0.000000e+00> : vector<1x32xf32>
    %154 = tpu.matmul %112, %153, %cst_94 {dimension_numbers = #tpu.dot_dimension_numbers<[1], [0], [0], [1], [0, 0, 1, 1], [], []>} : vector<1x32xf32>, vector<32x32xf32>, vector<1x32xf32> -> vector<1x32xf32>
    %155 = arith.addf %152, %154 : vector<1x32xf32>
    %156 = vector.extract_strided_slice %150 {offsets = [64, 0], sizes = [32, 32], strides = [1, 1]} : vector<128x32xf32> to vector<32x32xf32>
    %cst_95 = arith.constant dense<0.000000e+00> : vector<1x32xf32>
    %157 = tpu.matmul %72, %156, %cst_95 {dimension_numbers = #tpu.dot_dimension_numbers<[1], [0], [0], [1], [0, 0, 1, 1], [], []>} : vector<1x32xf32>, vector<32x32xf32>, vector<1x32xf32> -> vector<1x32xf32>
    %158 = arith.addf %155, %157 : vector<1x32xf32>
    %159 = vector.extract_strided_slice %150 {offsets = [96, 0], sizes = [32, 32], strides = [1, 1]} : vector<128x32xf32> to vector<32x32xf32>
    %cst_96 = arith.constant dense<0.000000e+00> : vector<1x32xf32>
    %160 = tpu.matmul %147, %159, %cst_96 {dimension_numbers = #tpu.dot_dimension_numbers<[1], [0], [0], [1], [0, 0, 1, 1], [], []>} : vector<1x32xf32>, vector<32x32xf32>, vector<1x32xf32> -> vector<1x32xf32>
    %161 = arith.addf %158, %160 : vector<1x32xf32>
    %c0_97 = arith.constant 0 : index
    %c0_98 = arith.constant 0 : index
    %162 = vector.load %arg22[%c0_97, %c0_98] : memref<1x32xf32, #tpu.memory_space<vmem>>, vector<1x32xf32>
    %163 = arith.addf %161, %162 : vector<1x32xf32>
    %cst_99 = arith.constant 0.000000e+00 : f32
    %164 = vector.broadcast %cst_99 : f32 to vector<1x32xf32>
    %165 = arith.cmpf oge, %163, %164 : vector<1x32xf32>
    %cst_100 = arith.constant 2.500000e-01 : f32
    %166 = vector.broadcast %cst_100 : f32 to vector<1x32xf32>
    %167 = arith.mulf %166, %163 : vector<1x32xf32>
    %168 = arith.select %165, %163, %167 : vector<1x32xi1>, vector<1x32xf32>
    %c0_101 = arith.constant 0 : index
    %c0_102 = arith.constant 0 : index
    %169 = vector.load %arg23[%c0_101, %c0_102] : memref<1x32xf32, #tpu.memory_space<vmem>>, vector<1x32xf32>
    tpu.vector_store %arg23[%c0_101, %c0_102], %168 {strides = array<i32>} : memref<1x32xf32, #tpu.memory_space<vmem>>, vector<1x32xf32>,
    return
  }
}

module attributes {stable_mosaic.version = 11 : i64} {
  func.func @_decode_kernel(%arg0: i32, %arg1: memref<1x32xf32, #tpu.memory_space<vmem>>, %arg2: memref<1x32x8xf32, #tpu.memory_space<vmem>>, %arg3: memref<1x1x8xf32, #tpu.memory_space<vmem>>, %arg4: memref<1x40x10xf32, #tpu.memory_space<vmem>>, %arg5: memref<1x1x10xf32, #tpu.memory_space<vmem>>, %arg6: memref<1x50x16xf32, #tpu.memory_space<vmem>>, %arg7: memref<1x1x16xf32, #tpu.memory_space<vmem>>, %arg8: memref<1x1x8xf32, #tpu.memory_space<vmem>>, %arg9: memref<1x1x10xf32, #tpu.memory_space<vmem>>, %arg10: memref<1x1x8xf32, #tpu.memory_space<vmem>>, %arg11: memref<1x1x10xf32, #tpu.memory_space<vmem>>, %arg12: memref<1x1x10xf32, #tpu.memory_space<vmem>>, %arg13: memref<1x1x6xf32, #tpu.memory_space<vmem>>) attributes {dimension_semantics = [#tpu.dimension_semantics<parallel>], iteration_bounds = array<i64: 2>, scalar_prefetch = 0 : i64, scratch_operands = 0 : i64, tpu.core_type = #tpu.core_type<tc>, window_params = [{pipeline_mode = #tpu.pipeline_mode<synchronous>, transform_indices = @transform_0, window_bounds = array<i64: 1, 32>}, {transform_indices = @transform_1, window_bounds = array<i64: 1, 32, 8>}, {transform_indices = @transform_2, window_bounds = array<i64: 1, 1, 8>}, {transform_indices = @transform_3, window_bounds = array<i64: 1, 40, 10>}, {transform_indices = @transform_4, window_bounds = array<i64: 1, 1, 10>}, {transform_indices = @transform_5, window_bounds = array<i64: 1, 50, 16>}, {transform_indices = @transform_6, window_bounds = array<i64: 1, 1, 16>}, {transform_indices = @transform_7, window_bounds = array<i64: 1, 1, 8>}, {transform_indices = @transform_8, window_bounds = array<i64: 1, 1, 10>}, {transform_indices = @transform_9, window_bounds = array<i64: 1, 1, 8>}, {transform_indices = @transform_10, window_bounds = array<i64: 1, 1, 10>}, {transform_indices = @transform_11, window_bounds = array<i64: 1, 1, 10>}, {transform_indices = @transform_12, window_bounds = array<i64: 1, 1, 6>}]} {
    %c0 = arith.constant 0 : index
    %c0_0 = arith.constant 0 : index
    %0 = vector.load %arg1[%c0, %c0_0] : memref<1x32xf32, #tpu.memory_space<vmem>>, vector<1x32xf32>
    %c0_1 = arith.constant 0 : index
    %c0_2 = arith.constant 0 : index
    %c0_3 = arith.constant 0 : index
    %1 = vector.load %arg2[%c0_1, %c0_2, %c0_3] : memref<1x32x8xf32, #tpu.memory_space<vmem>>, vector<1x32x8xf32>
    %2 = vector.shape_cast %1 : vector<1x32x8xf32> to vector<32x8xf32>
    %cst = arith.constant dense<0.000000e+00> : vector<1x8xf32>
    %3 = tpu.matmul %0, %2, %cst {dimension_numbers = #tpu.dot_dimension_numbers<[1], [0], [0], [1], [0, 0, 1, 1], [], []>} : vector<1x32xf32>, vector<32x8xf32>, vector<1x8xf32> -> vector<1x8xf32>
    %c0_4 = arith.constant 0 : index
    %c0_5 = arith.constant 0 : index
    %c0_6 = arith.constant 0 : index
    %4 = vector.load %arg3[%c0_4, %c0_5, %c0_6] : memref<1x1x8xf32, #tpu.memory_space<vmem>>, vector<1x1x8xf32>
    %5 = vector.shape_cast %4 : vector<1x1x8xf32> to vector<1x8xf32>
    %6 = arith.addf %3, %5 : vector<1x8xf32>
    %cst_7 = arith.constant dense<0xFF800000> : vector<1xf32>
    %7 = vector.multi_reduction <maximumf>, %6, %cst_7 [1] : vector<1x8xf32> to vector<1xf32>
    %8 = vector.shape_cast %7 : vector<1xf32> to vector<1x1xf32>
    %9 = vector.broadcast %8 : vector<1x1xf32> to vector<1x8xf32>
    %10 = arith.subf %6, %9 : vector<1x8xf32>
    %11 = math.exp %10 : vector<1x8xf32>
    %cst_8 = arith.constant dense<0.000000e+00> : vector<1xf32>
    %12 = vector.multi_reduction <add>, %11, %cst_8 [1] : vector<1x8xf32> to vector<1xf32>
    %13 = vector.shape_cast %12 : vector<1xf32> to vector<1x1xf32>
    %14 = vector.broadcast %13 : vector<1x1xf32> to vector<1x8xf32>
    %15 = arith.divf %11, %14 : vector<1x8xf32>
    %c0_9 = arith.constant 0 : index
    %c0_10 = arith.constant 0 : index
    %c0_11 = arith.constant 0 : index
    %16 = vector.load %arg8[%c0_9, %c0_10, %c0_11] : memref<1x1x8xf32, #tpu.memory_space<vmem>>, vector<1x1x8xf32>
    %17 = vector.shape_cast %16 : vector<1x1x8xf32> to vector<1x8xf32>
    %18 = arith.addf %15, %17 : vector<1x8xf32>
    %cst_12 = arith.constant 1.000000e+02 : f32
    %19 = vector.broadcast %cst_12 : f32 to vector<1x8xf32>
    %20 = arith.mulf %18, %19 : vector<1x8xf32>
    %cst_13 = arith.constant dense<0xFF800000> : vector<1xf32>
    %21 = vector.multi_reduction <maximumf>, %20, %cst_13 [1] : vector<1x8xf32> to vector<1xf32>
    %22 = vector.shape_cast %21 : vector<1xf32> to vector<1x1xf32>
    %23 = vector.broadcast %22 : vector<1x1xf32> to vector<1x8xf32>
    %24 = arith.subf %20, %23 : vector<1x8xf32>
    %25 = math.exp %24 : vector<1x8xf32>
    %cst_14 = arith.constant dense<0.000000e+00> : vector<1xf32>
    %26 = vector.multi_reduction <add>, %25, %cst_14 [1] : vector<1x8xf32> to vector<1xf32>
    %27 = vector.shape_cast %26 : vector<1xf32> to vector<1x1xf32>
    %28 = vector.broadcast %27 : vector<1x1xf32> to vector<1x8xf32>
    %29 = arith.divf %25, %28 : vector<1x8xf32>
    %c0_15 = arith.constant 0 : index
    %c0_16 = arith.constant 0 : index
    %c0_17 = arith.constant 0 : index
    %30 = vector.load %arg4[%c0_15, %c0_16, %c0_17] : memref<1x40x10xf32, #tpu.memory_space<vmem>>, vector<1x40x10xf32>
    %31 = vector.shape_cast %30 : vector<1x40x10xf32> to vector<40x10xf32>
    %32 = vector.extract_strided_slice %31 {offsets = [0, 0], sizes = [32, 10], strides = [1, 1]} : vector<40x10xf32> to vector<32x10xf32>
    %cst_18 = arith.constant dense<0.000000e+00> : vector<1x10xf32>
    %33 = tpu.matmul %0, %32, %cst_18 {dimension_numbers = #tpu.dot_dimension_numbers<[1], [0], [0], [1], [0, 0, 1, 1], [], []>} : vector<1x32xf32>, vector<32x10xf32>, vector<1x10xf32> -> vector<1x10xf32>
    %34 = vector.extract_strided_slice %31 {offsets = [32, 0], sizes = [8, 10], strides = [1, 1]} : vector<40x10xf32> to vector<8x10xf32>
    %cst_19 = arith.constant dense<0.000000e+00> : vector<1x10xf32>
    %35 = tpu.matmul %29, %34, %cst_19 {dimension_numbers = #tpu.dot_dimension_numbers<[1], [0], [0], [1], [0, 0, 1, 1], [], []>} : vector<1x8xf32>, vector<8x10xf32>, vector<1x10xf32> -> vector<1x10xf32>
    %36 = arith.addf %33, %35 : vector<1x10xf32>
    %c0_20 = arith.constant 0 : index
    %c0_21 = arith.constant 0 : index
    %c0_22 = arith.constant 0 : index
    %37 = vector.load %arg5[%c0_20, %c0_21, %c0_22] : memref<1x1x10xf32, #tpu.memory_space<vmem>>, vector<1x1x10xf32>
    %38 = vector.shape_cast %37 : vector<1x1x10xf32> to vector<1x10xf32>
    %39 = arith.addf %36, %38 : vector<1x10xf32>
    %cst_23 = arith.constant dense<0xFF800000> : vector<1xf32>
    %40 = vector.multi_reduction <maximumf>, %39, %cst_23 [1] : vector<1x10xf32> to vector<1xf32>
    %41 = vector.shape_cast %40 : vector<1xf32> to vector<1x1xf32>
    %42 = vector.broadcast %41 : vector<1x1xf32> to vector<1x10xf32>
    %43 = arith.subf %39, %42 : vector<1x10xf32>
    %44 = math.exp %43 : vector<1x10xf32>
    %cst_24 = arith.constant dense<0.000000e+00> : vector<1xf32>
    %45 = vector.multi_reduction <add>, %44, %cst_24 [1] : vector<1x10xf32> to vector<1xf32>
    %46 = vector.shape_cast %45 : vector<1xf32> to vector<1x1xf32>
    %47 = vector.broadcast %46 : vector<1x1xf32> to vector<1x10xf32>
    %48 = arith.divf %44, %47 : vector<1x10xf32>
    %c0_25 = arith.constant 0 : index
    %c0_26 = arith.constant 0 : index
    %c0_27 = arith.constant 0 : index
    %49 = vector.load %arg9[%c0_25, %c0_26, %c0_27] : memref<1x1x10xf32, #tpu.memory_space<vmem>>, vector<1x1x10xf32>
    %50 = vector.shape_cast %49 : vector<1x1x10xf32> to vector<1x10xf32>
    %51 = arith.addf %48, %50 : vector<1x10xf32>
    %cst_28 = arith.constant 1.000000e+02 : f32
    %52 = vector.broadcast %cst_28 : f32 to vector<1x10xf32>
    %53 = arith.mulf %51, %52 : vector<1x10xf32>
    %cst_29 = arith.constant dense<0xFF800000> : vector<1xf32>
    %54 = vector.multi_reduction <maximumf>, %53, %cst_29 [1] : vector<1x10xf32> to vector<1xf32>
    %55 = vector.shape_cast %54 : vector<1xf32> to vector<1x1xf32>
    %56 = vector.broadcast %55 : vector<1x1xf32> to vector<1x10xf32>
    %57 = arith.subf %53, %56 : vector<1x10xf32>
    %58 = math.exp %57 : vector<1x10xf32>
    %cst_30 = arith.constant dense<0.000000e+00> : vector<1xf32>
    %59 = vector.multi_reduction <add>, %58, %cst_30 [1] : vector<1x10xf32> to vector<1xf32>
    %60 = vector.shape_cast %59 : vector<1xf32> to vector<1x1xf32>
    %61 = vector.broadcast %60 : vector<1x1xf32> to vector<1x10xf32>
    %62 = arith.divf %58, %61 : vector<1x10xf32>
    %c0_31 = arith.constant 0 : index
    %c0_32 = arith.constant 0 : index
    %c0_33 = arith.constant 0 : index
    %63 = vector.load %arg6[%c0_31, %c0_32, %c0_33] : memref<1x50x16xf32, #tpu.memory_space<vmem>>, vector<1x50x16xf32>
    %64 = vector.shape_cast %63 : vector<1x50x16xf32> to vector<50x16xf32>
    %65 = vector.extract_strided_slice %64 {offsets = [0, 0], sizes = [32, 16], strides = [1, 1]} : vector<50x16xf32> to vector<32x16xf32>
    %cst_34 = arith.constant dense<0.000000e+00> : vector<1x16xf32>
    %66 = tpu.matmul %0, %65, %cst_34 {dimension_numbers = #tpu.dot_dimension_numbers<[1], [0], [0], [1], [0, 0, 1, 1], [], []>} : vector<1x32xf32>, vector<32x16xf32>, vector<1x16xf32> -> vector<1x16xf32>
    %67 = vector.extract_strided_slice %64 {offsets = [32, 0], sizes = [8, 16], strides = [1, 1]} : vector<50x16xf32> to vector<8x16xf32>
    %cst_35 = arith.constant dense<0.000000e+00> : vector<1x16xf32>
    %68 = tpu.matmul %29, %67, %cst_35 {dimension_numbers = #tpu.dot_dimension_numbers<[1], [0], [0], [1], [0, 0, 1, 1], [], []>} : vector<1x8xf32>, vector<8x16xf32>, vector<1x16xf32> -> vector<1x16xf32>
    %69 = arith.addf %66, %68 : vector<1x16xf32>
    %70 = vector.extract_strided_slice %64 {offsets = [40, 0], sizes = [10, 16], strides = [1, 1]} : vector<50x16xf32> to vector<10x16xf32>
    %cst_36 = arith.constant dense<0.000000e+00> : vector<1x16xf32>
    %71 = tpu.matmul %62, %70, %cst_36 {dimension_numbers = #tpu.dot_dimension_numbers<[1], [0], [0], [1], [0, 0, 1, 1], [], []>} : vector<1x10xf32>, vector<10x16xf32>, vector<1x16xf32> -> vector<1x16xf32>
    %72 = arith.addf %69, %71 : vector<1x16xf32>
    %c0_37 = arith.constant 0 : index
    %c0_38 = arith.constant 0 : index
    %c0_39 = arith.constant 0 : index
    %73 = vector.load %arg7[%c0_37, %c0_38, %c0_39] : memref<1x1x16xf32, #tpu.memory_space<vmem>>, vector<1x1x16xf32>
    %74 = vector.shape_cast %73 : vector<1x1x16xf32> to vector<1x16xf32>
    %75 = arith.addf %72, %74 : vector<1x16xf32>
    %76 = vector.extract_strided_slice %75 {offsets = [0, 0], sizes = [1, 10], strides = [1, 1]} : vector<1x16xf32> to vector<1x10xf32>
    %cst_40 = arith.constant dense<0xFF800000> : vector<1xf32>
    %77 = vector.multi_reduction <maximumf>, %76, %cst_40 [1] : vector<1x10xf32> to vector<1xf32>
    %78 = vector.shape_cast %77 : vector<1xf32> to vector<1x1xf32>
    %79 = vector.broadcast %78 : vector<1x1xf32> to vector<1x10xf32>
    %80 = arith.subf %76, %79 : vector<1x10xf32>
    %81 = math.exp %80 : vector<1x10xf32>
    %cst_41 = arith.constant dense<0.000000e+00> : vector<1xf32>
    %82 = vector.multi_reduction <add>, %81, %cst_41 [1] : vector<1x10xf32> to vector<1xf32>
    %83 = vector.shape_cast %82 : vector<1xf32> to vector<1x1xf32>
    %84 = vector.broadcast %83 : vector<1x1xf32> to vector<1x10xf32>
    %85 = arith.divf %81, %84 : vector<1x10xf32>
    %86 = vector.extract_strided_slice %75 {offsets = [0, 10], sizes = [1, 6], strides = [1, 1]} : vector<1x16xf32> to vector<1x6xf32>
    %cst_42 = arith.constant dense<0xFF800000> : vector<1xf32>
    %87 = vector.multi_reduction <maximumf>, %86, %cst_42 [1] : vector<1x6xf32> to vector<1xf32>
    %88 = vector.shape_cast %87 : vector<1xf32> to vector<1x1xf32>
    %89 = vector.broadcast %88 : vector<1x1xf32> to vector<1x6xf32>
    %90 = arith.subf %86, %89 : vector<1x6xf32>
    %91 = math.exp %90 : vector<1x6xf32>
    %cst_43 = arith.constant dense<0.000000e+00> : vector<1xf32>
    %92 = vector.multi_reduction <add>, %91, %cst_43 [1] : vector<1x6xf32> to vector<1xf32>
    %93 = vector.shape_cast %92 : vector<1xf32> to vector<1x1xf32>
    %94 = vector.broadcast %93 : vector<1x1xf32> to vector<1x6xf32>
    %95 = arith.divf %91, %94 : vector<1x6xf32>
    %c0_44 = arith.constant 0 : index
    %c0_45 = arith.constant 0 : index
    %c0_46 = arith.constant 0 : index
    %96 = vector.load %arg10[%c0_44, %c0_45, %c0_46] : memref<1x1x8xf32, #tpu.memory_space<vmem>>, vector<1x1x8xf32>
    %97 = vector.shape_cast %96 : vector<1x1x8xf32> to vector<1x8xf32>
    %98 = vector.shape_cast %15 : vector<1x8xf32> to vector<1x1x8xf32>
    tpu.vector_store %arg10[%c0_44, %c0_45, %c0_46], %98 {strides = array<i32>} : memref<1x1x8xf32, #tpu.memory_space<vmem>>, vector<1x1x8xf32>,
    %c0_47 = arith.constant 0 : index
    %c0_48 = arith.constant 0 : index
    %c0_49 = arith.constant 0 : index
    %99 = vector.load %arg11[%c0_47, %c0_48, %c0_49] : memref<1x1x10xf32, #tpu.memory_space<vmem>>, vector<1x1x10xf32>
    %100 = vector.shape_cast %99 : vector<1x1x10xf32> to vector<1x10xf32>
    %101 = vector.shape_cast %48 : vector<1x10xf32> to vector<1x1x10xf32>
    tpu.vector_store %arg11[%c0_47, %c0_48, %c0_49], %101 {strides = array<i32>} : memref<1x1x10xf32, #tpu.memory_space<vmem>>, vector<1x1x10xf32>,
    %c0_50 = arith.constant 0 : index
    %c0_51 = arith.constant 0 : index
    %c0_52 = arith.constant 0 : index
    %102 = vector.load %arg12[%c0_50, %c0_51, %c0_52] : memref<1x1x10xf32, #tpu.memory_space<vmem>>, vector<1x1x10xf32>
    %103 = vector.shape_cast %102 : vector<1x1x10xf32> to vector<1x10xf32>
    %104 = vector.shape_cast %85 : vector<1x10xf32> to vector<1x1x10xf32>
    tpu.vector_store %arg12[%c0_50, %c0_51, %c0_52], %104 {strides = array<i32>} : memref<1x1x10xf32, #tpu.memory_space<vmem>>, vector<1x1x10xf32>,
    %c0_53 = arith.constant 0 : index
    %c0_54 = arith.constant 0 : index
    %c0_55 = arith.constant 0 : index
    %105 = vector.load %arg13[%c0_53, %c0_54, %c0_55] : memref<1x1x6xf32, #tpu.memory_space<vmem>>, vector<1x1x6xf32>
    %106 = vector.shape_cast %105 : vector<1x1x6xf32> to vector<1x6xf32>
    %107 = vector.shape_cast %95 : vector<1x6xf32> to vector<1x1x6xf32>
    tpu.vector_store %arg13[%c0_53, %c0_54, %c0_55], %107 {strides = array<i32>} : memref<1x1x6xf32, #tpu.memory_space<vmem>>, vector<1x1x6xf32>,
    return
  }
  func.func @transform_0(%arg0: i32) -> (i32, i32) {
    %c0_i32 = arith.constant 0 : i32
    %c0_i32_0 = arith.constant 0 : i32
    %c0_i32_1 = arith.constant 0 : i32
    return %c0_i32, %c0_i32_0 : i32, i32
  }
  func.func @transform_1(%arg0: i32) -> (i32, i32, i32) {
    %c0_i32 = arith.constant 0 : i32
    %c0_i32_0 = arith.constant 0 : i32
    %c0_i32_1 = arith.constant 0 : i32
    return %arg0, %c0_i32, %c0_i32_0 : i32, i32, i32
  }
  func.func @transform_2(%arg0: i32) -> (i32, i32, i32) {
    %c0_i32 = arith.constant 0 : i32
    %c0_i32_0 = arith.constant 0 : i32
    %c0_i32_1 = arith.constant 0 : i32
    return %arg0, %c0_i32, %c0_i32_0 : i32, i32, i32
  }
  func.func @transform_3(%arg0: i32) -> (i32, i32, i32) {
    %c0_i32 = arith.constant 0 : i32
    %c0_i32_0 = arith.constant 0 : i32
    %c0_i32_1 = arith.constant 0 : i32
    return %arg0, %c0_i32, %c0_i32_0 : i32, i32, i32
  }
  func.func @transform_4(%arg0: i32) -> (i32, i32, i32) {
    %c0_i32 = arith.constant 0 : i32
    %c0_i32_0 = arith.constant 0 : i32
    %c0_i32_1 = arith.constant 0 : i32
    return %arg0, %c0_i32, %c0_i32_0 : i32, i32, i32
  }
  func.func @transform_5(%arg0: i32) -> (i32, i32, i32) {
    %c0_i32 = arith.constant 0 : i32
    %c0_i32_0 = arith.constant 0 : i32
    %c0_i32_1 = arith.constant 0 : i32
    return %arg0, %c0_i32, %c0_i32_0 : i32, i32, i32
  }
  func.func @transform_6(%arg0: i32) -> (i32, i32, i32) {
    %c0_i32 = arith.constant 0 : i32
    %c0_i32_0 = arith.constant 0 : i32
    %c0_i32_1 = arith.constant 0 : i32
    return %arg0, %c0_i32, %c0_i32_0 : i32, i32, i32
  }
  func.func @transform_7(%arg0: i32) -> (i32, i32, i32) {
    %c0_i32 = arith.constant 0 : i32
    %c0_i32_0 = arith.constant 0 : i32
    %c0_i32_1 = arith.constant 0 : i32
    return %arg0, %c0_i32, %c0_i32_0 : i32, i32, i32
  }
  func.func @transform_8(%arg0: i32) -> (i32, i32, i32) {
    %c0_i32 = arith.constant 0 : i32
    %c0_i32_0 = arith.constant 0 : i32
    %c0_i32_1 = arith.constant 0 : i32
    return %arg0, %c0_i32, %c0_i32_0 : i32, i32, i32
  }
  func.func @transform_9(%arg0: i32) -> (i32, i32, i32) {
    %c0_i32 = arith.constant 0 : i32
    %c0_i32_0 = arith.constant 0 : i32
    %c0_i32_1 = arith.constant 0 : i32
    return %arg0, %c0_i32, %c0_i32_0 : i32, i32, i32
  }
  func.func @transform_10(%arg0: i32) -> (i32, i32, i32) {
    %c0_i32 = arith.constant 0 : i32
    %c0_i32_0 = arith.constant 0 : i32
    %c0_i32_1 = arith.constant 0 : i32
    return %arg0, %c0_i32, %c0_i32_0 : i32, i32, i32
  }
  func.func @transform_11(%arg0: i32) -> (i32, i32, i32) {
    %c0_i32 = arith.constant 0 : i32
    %c0_i32_0 = arith.constant 0 : i32
    %c0_i32_1 = arith.constant 0 : i32
    return %arg0, %c0_i32, %c0_i32_0 : i32, i32, i32
  }
  func.func @transform_12(%arg0: i32) -> (i32, i32, i32) {
    %c0_i32 = arith.constant 0 : i32
    %c0_i32_0 = arith.constant 0 : i32
    %c0_i32_1 = arith.constant 0 : i32
    return %arg0, %c0_i32, %c0_i32_0 : i32, i32, i32
  }
}

</mosaic_0001>

<bundles_post_ra>
// kernel: _lambda_.3
= control target key start
LH: loop header
LB: loop body
LE: loop exit
PB: predicated region body
PF: predicated region fallthrough
CT: control target
= control target key end

     0   :  { %16 = vsyncpa [#allocation3], 0  ;;  %s1670_s0 = inlined_call_operand.vmem [shape: f32[8,16], index: 0, kind: input, shape index: {}]   ;;  %s1671_s1 = inlined_call_operand.hbm [shape: f32[5,8,8], index: 1, kind: input, shape index: {}]   ;;  %s1672_s2 = inlined_call_operand.vmem [shape: f32[5,16,16], index: 2, kind: input, shape index: {}]   ;;  %s1673_s3 = inlined_call_operand.vmem [shape: f32[5,1,16], index: 3, kind: input, shape index: {}]   ;;  %s1674_s4 = inlined_call_operand.hbm [shape: f32[5,16,1], index: 4, kind: input, shape index: {}]   ;;  %s1675_s5 = inlined_call_operand.vmem [shape: f32[5,1,16], index: 5, kind: input, shape index: {}]   ;;  %s1676_s6 = inlined_call_operand.vmem [shape: f32[16,16], index: 6, kind: input, shape index: {}]   ;;  %s1677_s7 = inlined_call_operand.vmem [shape: f32[1,16], index: 7, kind: input, shape index: {}]   ;;  %s1678_s8 = inlined_call_operand.vmem [shape: f32[16,1], index: 8, kind: input, shape index: {}]   ;;  %s1679_s9 = inlined_call_operand.vmem [shape: f32[5,8,16], index: 9, kind: output, shape index: {0}]   ;;  %s1680_s10 = inlined_call_operand.vmem [shape: f32[5,1,1], index: 10, kind: output, shape index: {1}]  }
   0x1   :  { %18 = vsyncpa [#allocation3 + $0x1], 0 }
   0x2   :  { %19 = vsyncpa [#allocation5], 0 }
   0x3   :  { %21 = vsyncpa [#allocation5 + $0x1], 0  ;;  %s1450_s13 = smov 0   ;;  %s1452_s14 = smov 0  }
   0x4   :  { %s1454_s15 = smov 0   ;;  %s1456_s16 = smov 0  }
   0x5 LB: > { %s1469_s17 = sadd.s32 4294967295, %s1385_s16   ;;  %s1472_s18 = sadd.s32 1, %s1385_s16   ;;  %s1385_s16 = sphi %s1456_s16, %s1691_s16   ;;  %s1381_s15 = sphi %s1454_s15, %s1690_s15   ;;  %s1377_s14 = sphi %s1452_s14, %s1689_s14   ;;  %s1373_s13 = sphi %s1450_s13, %s1688_s13  }
   0x6   : > { %s52_s19 = ssub.s32 %s1385_s16, %s1472_s18  ;;  %s55_s20 = sadd.s32 1, %s1381_s15 }
   0x7   : > { %p53_p0 = scmp.eq.s32.totalorder %s52_s19, 0  ;;  %p62_p1 = scmp.ne.s32.totalorder %s1381_s15, %s1377_s14 }
   0x8   : > { %p63_p2 = scmp.eq.s32.totalorder %s1385_s16, 0  ;;  %p68_p3 = scmp.ne.s32.totalorder %s1377_s14, %s1373_s13 }
   0x9   : > { %s1482_s21 = scalar_select %p53_p0, %s1381_s15, %s55_s20  }
   0xa   : > { %p64_p4 = por %p63_p2, %p62_p1  ;;  %p69_p5 = scmp.eq.s32.totalorder %s1469_s17, 0 }
   0xb   : > { %p1239_p6 = scmp.lt.s32.totalorder %s1385_s16, 5  ;;  %s1491_s23 = sand.u32 1, %s1381_s15  }
   0xc   : > { %p1486_p7 = por %p69_p5, %p68_p3  ;;  %s1135_s24 = sshll.u32 %s1491_s23, 3 }
   0xd   : > { %s1136_s25 = sshll.u32 %s1385_s16, 7  ;;  %s327_s29 = scalar_lea.vmem [#allocation2], %s1135_s24 }
   0xe   : > { %s1682_s22 = scalar_select %p1486_p7, 1, 0 }
   0xf   : > { %s1498_s28 = scalar_lea.hbm %s1671_s1, %s1136_s25  ;;  %s334_s30 = sshll.u32 %s327_s29, 4  ;;  %s1500_s30 = int_to_ptr.vmem [resolvable:$true] %s334_s30 }
  0x10   : > { %p1502_p8 = pnand %p1239_p6, %p64_p4  ;;  %s324_s12 = scalar_lea.sflag [#allocation3], %s1491_s23 }
  0x11   : > { %s1287_s13 = scalar_lea.hbm %s1498_s28, 128  ;;  %s1292_s24 = scalar_lea.hbm %s1671_s1, 640 }
  0x12   : > { %p1288_p11 = scmp.ne.s32.totalorder %s1498_s28, %s1287_s13  ;;  %p1289_p12 = pneg %p1502_p8 }
  0x13   : > { %p1293_p1 = scmp.lt.u32.totalorder %s1498_s28, %s1671_s1  ;;  %p1294_p2 = scmp.lt.u32.totalorder %s1292_s24, %s1287_s13 }
  0x14   : > { %p1290_p13 = pnand %p1289_p12, %p1288_p11  ;;  %p1296_p4 = scmp.lt.u32.totalorder %s1287_s13, %s1498_s28 }
  0x15   : > { %p1295_p3 = por %p1294_p2, %p1293_p1 }
  0x16   : > { %p1291_p0 = pneg %p1290_p13 }
  0x17   : > { %p1297_p5 = por %p1296_p4, %p1295_p3 }
  0x19   : > { %p1298_p6 = pnand %p1297_p5, %p1291_p0 }
  0x1b   : > { %1301 = shalt.err (!%p1298_p6)
}
  0x1c   : > { %s1302_s27 = scalar_lea.vmem %s1500_s30, 128  ;;  %s1387_s29 = smov [#allocation2]  }
  0x1d   : > { %p1303_p11 = scmp.ne.s32.totalorder %s1500_s30, %s1302_s27  ;;  %s1307_s19 = sshll.u32 %s1387_s29, 4  ;;  %s1308_s19 = int_to_ptr.vmem [resolvable:$false] %s1307_s19 }
  0x1e   : > { %s1309_s20 = scalar_lea.vmem %s1308_s19, 256  ;;  %p1310_p10 = scmp.lt.s32.totalorder %s1500_s30, %s1308_s19 }
  0x1f   : > { %p1305_p13 = pnand %p1303_p11, %p1289_p12  ;;  %p1311_p1 = scmp.lt.s32.totalorder %s1309_s20, %s1302_s27 }
  0x21   : > { %p1306_p9 = pneg %p1305_p13  ;;  %p1312_p2 = por %p1311_p1, %p1310_p10 }
  0x23   : > { %p1313_p3 = pnand %p1312_p2, %p1306_p9 }
  0x25   : > { %1316 = shalt.err (!%p1313_p3)
}
  0x26   : > { %1235 = dma.hbm_to_vmem [thread:$0]  (!%p1502_p8), %s1498_s28, 128, %s1500_s30, %s324_s12  }
  0x27   : > { %p1684_p0 = scmp.lt.s32.totalorder %s1385_s16, 6  ;;  %p1685_p4 = scmp.ge.s32.totalorder %s1385_s16, 1 }
  0x28   : > { %s1137_s24 = sshll.u32 %s1491_s23, 4  ;;  %s1158_s25 = sshll.u32 %s1385_s16, 8 }
  0x29   : > { %p1538_p5 = pnand %p1685_p4, %p1684_p0  ;;  %s1547_s29 = scalar_lea.hbm %s1674_s4, %s1158_s25 }
  0x2a   : > { %s359_s19 = scalar_lea.vmem [#allocation4], %s1137_s24  ;;  %s356_s28 = scalar_lea.sflag [#allocation5], %s1491_s23 }
  0x2b   : > { %s366_s20 = sshll.u32 %s359_s19, 4  ;;  %s1317_s30 = scalar_lea.hbm %s1547_s29, 256  ;;  %s1549_s20 = int_to_ptr.vmem [resolvable:$true] %s366_s20 }
  0x2c   : > { %p1318_p9 = scmp.ne.s32.totalorder %s1547_s29, %s1317_s30  ;;  %s1322_s25 = scalar_lea.hbm %s1674_s4, 1280 }
  0x2d   : > { %p1323_p11 = scmp.lt.u32.totalorder %s1547_s29, %s1674_s4  ;;  %p1324_p13 = scmp.lt.u32.totalorder %s1322_s25, %s1317_s30 }
  0x2e   : > { %p1320_p10 = pnand %p1318_p9, %p1289_p12  ;;  %p1326_p2 = scmp.lt.u32.totalorder %s1317_s30, %s1547_s29 }
  0x2f   : > { %p1325_p1 = por %p1324_p13, %p1323_p11 }
  0x30   : > { %p1321_p6 = pneg %p1320_p10 }
  0x31   : > { %p1327_p3 = por %p1326_p2, %p1325_p1 }
  0x33   : > { %p1328_p0 = pnand %p1327_p3, %p1321_p6 }
  0x35   : > { %1331 = shalt.err (!%p1328_p0)
}
  0x36   : > { %s1332_s24 = scalar_lea.vmem %s1549_s20, 256  ;;  %s1388_s19 = smov [#allocation4]  }
  0x37   : > { %p1333_p4 = scmp.ne.s32.totalorder %s1549_s20, %s1332_s24  ;;  %s1337_s16 = sshll.u32 %s1388_s19, 4  ;;  %s1338_s16 = int_to_ptr.vmem [resolvable:$false] %s1337_s16 }
  0x38   : > { %s1339_s12 = scalar_lea.vmem %s1338_s16, 512  ;;  %p1340_p7 = scmp.lt.s32.totalorder %s1549_s20, %s1338_s16 }
  0x39   : > { %p1335_p9 = pnand %p1333_p4, %p1289_p12  ;;  %p1341_p11 = scmp.lt.s32.totalorder %s1339_s12, %s1332_s24 }
  0x3b   : > { %p1336_p10 = pneg %p1335_p9  ;;  %p1342_p13 = por %p1341_p11, %p1340_p7 }
  0x3d   : > { %p1343_p1 = pnand %p1342_p13, %p1336_p10 }
  0x3f   : > { %1346 = shalt.err (!%p1343_p1)
}
  0x40   : > { %s1389_s30 = smov 128   ;;  %s1390_s25 = smov 8  }
  0x41   : > { %1238 = dma.hbm_to_vmem [thread:$0]  (!%p1502_p8), %s1547_s29, 256, %s1549_s20, %s356_s28, %s1389_s30, %s1389_s30, %s1390_s25  }
  0x42   : > { %384 = sbr.rel (%p1538_p5) target bundleno = 1841 (0x731), region = 56  ;;  %s386_s26 = sand.u32 (!%p1538_p5), 1, %s1377_s14  }
  0x43   : > { %s1141_s27 = sshll.u32 (!%p1538_p5), %s386_s26, 3  ;;  %s387_s24 = scalar_lea.sflag (!%p1538_p5), [#allocation3], %s386_s26 }
  0x44   : > { %s1580_s19 = scalar_lea.vmem (!%p1538_p5), [#allocation2], %s1141_s27  ;;  %p1687_p7 = scmp.ne.s32.totalorder (!%p1538_p5), %s1682_s22, 0 }
  0x49   : > { %1364 = dma.done.wait (%p1687_p7), %s387_s24, 128  }
  0x4a   : > { %1366 = vsyncadd (%p1687_p7), %s387_s24, 4294967168  ;;  %s1142_s16 = sshll.u32 %s386_s26, 4  ;;  %s396_s11 = scalar_lea.sflag [#allocation5], %s386_s26 }
  0x4b   : > { %s399_s23 = scalar_lea.vmem [#allocation4], %s1142_s16 }
  0x4c   : > { %1368 = dma.done.wait (%p1687_p7), %s396_s11, 256  }
  0x4d   : > { %1370 = vsyncadd (%p1687_p7), %s396_s11, 4294967040  ;;  %p454_p8 = scmp.lt.s32.totalorder %s1469_s17, 4  ;;  %v1391_v0 = vmov 0.0|0.0   ;;  %vm1392_vm0 = vmmov 0   ;;  %v1393_v1 = vmov 0.0   ;;  %v549_v5 = vld [vmem:[%s399_s23] sm:$0xff]  ;;  %v703_v17 = vlaneseq }
  0x4e   : > { %1214 = vmatprep.subr.bf16.mxu0 %v1391_v0  ;;  %1180 = vmatprep.mubr.msk.f32.mxu0 %vm1392_vm0, %v1393_v1  ;;  %v550_v6 = vld [vmem:[%s399_s23 + $0x8] sm:$0xff]  ;;  %v472_v8 = vld [vmem:[%s1670_s0] sm:$0xff]  ;;  %vm475_vm1 = vcmask 130048   ;;  %v1394_v9 = vmov 0   ;;  %vm714_vm4 = vcmask 64512   ;;  %vm973_vm6 = vcmask 7168  }
  0x4f   : > { %s1693_s17 = smov (!%p454_p8, %s1469_s17), 4  ;;  %1217 = vmatprep.subr.bf16.mxu1 %v1391_v0  ;;  %1187 = vmatprep.mubr.msk.f32.mxu1 %vm1392_vm0, %v1393_v1  ;;  %v1218_v7 = vpack.c.bf16 %v550_v6, %v549_v5  ;;  %v704_v18 = vshrl.u32 %v703_v17, 7  ;;  %v711_v22 = vld [vmem:[%s1580_s19] sm:$0xff]  ;;  %vm987_vm7 = vcmask 0  }
  0x50   : > { %s1159_s13 = sshll.u32 %s1693_s17, 4  ;;  %1278 = vset.pattern.permute.xlu0 %v1394_v9  ;;  %s461_s26 = scalar_lea.vmem %s1673_s3, %s1693_s17  ;;  %vm712_vm3 = vcmp.gt.f32.partialorder %v711_v22, 0.0  ;;  %v815_v38 = vld [vmem:[%s1676_s6] sm:$0xff]  ;;  %v816_v39 = vld [vmem:[%s1676_s6 + $0x8] sm:$0xff] }
  0x51   : > { %s458_s20 = scalar_lea.vmem %s1672_s2, %s1159_s13  ;;  %1219 = vmatpush3.bf16.msra.mxu1 %v1218_v7  ;;  %v624_v12 = vld [vmem:[%s461_s26] sm:$0x1]  ;;  %v705_v19 = vsub.s32 0, %v704_v18  ;;  %v1221_v40 = vpack.c.bf16 %v816_v39, %v815_v38  ;;  %s464_s13 = scalar_lea.vmem %s1675_s5, %s1693_s17  ;;  %v899_v51 = vld [vmem:[%s1678_s8 + $0x8] sm:$0xff] }
  0x52   : > { %v473_v2 = vld [vmem:[%s458_s20] sm:$0xff]  ;;  %v474_v3 = vld [vmem:[%s458_s20 + $0x8] sm:$0xff]  ;;  %1195 = vmatprep.subr.mxu1 %v1393_v1  ;;  %s1145_s22 = sshll.u32 %s1693_s17, 3  ;;  %s471_s23 = scalar_lea.vmem %s1680_s10, %s1693_s17 }
  0x53   : > { %v1215_v4 = vpack.c.bf16 %v474_v3, %v473_v2  ;;  %v1150_v41 = vld [vmem:[%s464_s13] ss:$0 sm:$0xff]  ;;  %s468_s28 = scalar_lea.vmem %s1679_s9, %s1145_s22 }
  0x54   : > { %v898_v50 = vld [vmem:[%s1678_s8] sm:$0xff] }
  0x55   : > { %1216 = vmatpush3.bf16.msra.mxu0 %v1215_v4  ;;  %v1224_v52 = vpack.c.bf16 %v899_v51, %v898_v50  ;;  %v1153_v53 = vld [vmem:[%s1677_s7] ss:$0 sm:$0xff] }
  0x56   : > { %1190 = vmatprep.subr.mxu0 %v1393_v1 }
  0x58   : > { %1181 = vmatmul.mubr.msk.f32.vlgmr.msra.gmra.mrb[0].mxu0 %vm475_vm1, %v472_v8 }
  0x59   : > { %1192 = vmatprep.mubr.msk.f32.mxu0 %vm1392_vm0, %v1393_v1 }
 0x12b   : > { %v545_v10 = vpop.f32.mrb[0].mxu0 }
 0x12c   : > { %v1182_v11 = vpop.f32.mrb[1].mxu0  ;;  %1188 = vmatmul.mubr.msk.f32.vlgmr.msra.gmra.mrb[0].mxu1 %vm475_vm1, %v545_v10  ;;  %1191 = vmatpush3.xpose.msk.msra.mxu0 %vm475_vm1, %v545_v10 }
 0x12d   : > { %1196 = vmatpush3.msra.mxu1 %v545_v10  ;;  %1197 = vmatprep.mubr.msk.f32.mxu1 %vm1392_vm0, %v1393_v1 }
 0x12e   : > { %1220 = vmatprep.subr.bf16.mxu0 %v1391_v0  ;;  %1223 = vmatprep.subr.bf16.mxu1 %v1391_v0 }
 0x12f   : > { %1193 = vmatmul.mubr.msk.f32.vlgmr.msra.gmra.mrb[2].mxu0 %vm475_vm1, %v624_v12 }
 0x130   : > { %1204 = vmatprep.mubr.msk.f32.mxu0 %vm1392_vm0, %v1393_v1  ;;  %1222 = vmatpush3.bf16.msra.mxu0 %v1221_v40 }
 0x1ff   : > { %v620_v13 = vpop.f32.mrb[0].mxu1 }
 0x200   : > { %700 = vperm.xlu0 %1278, %v620_v13   ;;  %v1189_v14 = vpop.f32.mrb[1].mxu1 }
 0x202   : > { %v694_v15 = vpop.f32.mrb[2].mxu0 }
 0x203   : > { %v1194_v16 = vpop.f32.mrb[3].mxu0  ;;  %v706_v20 = vrot.slane %v694_v15, %v705_v19 }
 0x27f   : > { %v701_v21 = vpop.permute.xlu0 %700 }
 0x280   : > { %v707_v23 = vadd.f32 %v706_v20, %v701_v21 }
 0x282   : > { %v709_v24 = vmul.f32 0.2, %v707_v23  ;;  %vm708_vm2 = vcmp.ge.f32.partialorder %v707_v23, 0.0 }
 0x284   : > { %v710_v25 = vsel %vm708_vm2, %v707_v23, %v709_v24 }
 0x285   : > { %v713_v26 = vsel %vm712_vm3, %v710_v25, -1e+30 }
 0x286   : > { %v715_v27 = vsel %vm714_vm4, %v713_v26, -inf }
 0x287   : > { %716 = vmax.xlane.f32.xlu0 %v715_v27 }
 0x314   : > { %v717_v28 = vpop.xlane.xlu0 %716 }
 0x315   : > { %v718_v29 = vsub.f32 %v713_v26, %v717_v28 }
 0x317   : > { %v719_v30 = vmul.f32 1.442695, %v718_v29 }
 0x319   : > { %1279 = vpow2.f32 %v719_v30 }
 0x323   : > { %v1280_v31 = vpop.eup %1279 }
 0x324   : > { %v721_v32 = vsel %vm712_vm3, %v1280_v31, 0.0 }
 0x325   : > { %v722_v33 = vsel %vm714_vm4, %v721_v32, 0.0 }
 0x326   : > { %723 = vadd.xlane.f32.xlu1 %v722_v33 }
 0x3b3   : > { %v724_v34 = vpop.xlane.xlu1 %723 }
 0x3b4   : > { %v725_v35 = vmax.f32 %v724_v34, 1e-30 }
 0x3b6   : > { %1281 = vrcp.f32 %v725_v35 }
 0x3c0   : > { %v1282_v36 = vpop.eup %1281 }
 0x3c1   : > { %v727_v37 = vmul.f32 %v1282_v36, %v721_v32 }
 0x3c3   : > { %1198 = vmatmul.mubr.msk.f32.vlgmr.msra.gmra.mrb[2].mxu1 %vm714_vm4, %v727_v37 }
 0x3c4   : > { %1211 = vmatprep.mubr.msk.f32.mxu1 %vm1392_vm0, %v1393_v1  ;;  %1225 = vmatpush3.bf16.msra.mxu1 %v1224_v52 }
 0x496   : > { %v804_v42 = vpop.f32.mrb[2].mxu1 }
 0x497   : > { %v805_v43 = vadd.f32 %v1150_v41, %v804_v42  ;;  %v1199_v44 = vpop.f32.mrb[3].mxu1 }
 0x499   : > { %v809_v45 = vmin.f32 %v805_v43, 0.0  ;;  %vm808_vm5 = vcmp.gt.f32.partialorder %v805_v43, 0.0 }
 0x49b   : > { %v810_v46 = vmul.f32 1.442695, %v809_v45 }
 0x49d   : > { %1283 = vpow2.f32 %v810_v46 }
 0x4a7   : > { %v1284_v47 = vpop.eup %1283 }
 0x4a8   : > { %v1152_v48 = vadd.f32 -1.0, %v1284_v47 }
 0x4aa   : > { %v813_v49 = vsel %vm808_vm5, %v805_v43, %v1152_v48 }
 0x4ab   : > { %814 = vst.msk [vmem:[%s468_s28] sm:$0xff] %vm475_vm1, %v813_v49  ;;  %1205 = vmatmul.mubr.msk.f32.vlgmr.msra.gmra.mrb[4].mxu0 %vm475_vm1, %v813_v49 }
 0x57e   : > { %v893_v54 = vpop.f32.mrb[4].mxu0 }
 0x57f   : > { %v894_v55 = vadd.f32 %v1153_v53, %v893_v54  ;;  %v1206_v56 = vpop.f32.mrb[5].mxu0 }
 0x581   : > { %1285 = vtanh.f32 %v894_v55 }
 0x58b   : > { %v1286_v57 = vpop.eup %1285 }
 0x58c   : > { %1212 = vmatmul.mubr.msk.f32.vlgmr.msra.gmra.mrb[4].mxu1 %vm475_vm1, %v1286_v57 }
 0x65f   : > { %v969_v58 = vpop.f32.mrb[4].mxu1 }
 0x660   : > { %v1213_v59 = vpop.f32.mrb[5].mxu1  ;;  %v974_v60 = vsel %vm973_vm6, %v969_v58, 0.0 }
 0x661   : > { %975 = vadd.xlane.f32.xlu1 %v974_v60 }
 0x6ee   : > { %v976_v61 = vpop.xlane.xlu1 %975 }
 0x6ef   : > { %v977_v62 = vrot.slane %v976_v61, 4 }
 0x6f1   : > { %v978_v63 = vadd.f32 %v977_v62, %v976_v61 }
 0x6f3   : > { %v979_v0 = vrot.slane %v978_v63, 2 }
 0x6f5   : > { %v980_v1 = vadd.f32 %v979_v0, %v978_v63 }
 0x6f7   : > { %v981_v2 = vrot.slane %v980_v1, 1 }
 0x6f9   : > { %v982_v3 = vadd.f32 %v981_v2, %v980_v1 }
 0x6fb   : > { %1226 = vpush %v982_v3 }
 0x72c   : > { %s1227_s19 = spop %1226 }
 0x72d   : > { %v984_v4 = vstv %s1227_s19 }
 0x72e   : > { %v986_v5 = vmul.f32 0.125, %v984_v4 }
 0x730   : > { %988 = vst.msk [vmem:[%s471_s23] sm:$0x1] %vm987_vm7, %v986_v5 }
 0x731 PF: > { %p24_p12 = scmp.ge.s32.totalorder %s1472_s18, 7   ;;  %s1688_s13 = smov %s1377_s14 }
 0x732   : > { %s1689_s14 = smov %s1381_s15  ;;  %s1690_s15 = smov %s1482_s21 }
 0x733   : > { %s1691_s16 = smov %s1472_s18  ;;  %26 = sbr.rel (!%p24_p12) target bundleno = 5 (0x5), region = 130 }
 0x73a   :  { %1020 = vsyncpa [#allocation3], 1 }
 0x73b   :  { %1022 = vsyncpa [#allocation3 + $0x1], 1 }
 0x73c   :  { %1023 = vsyncpa [#allocation5], 1 }
 0x73d   :  { %1025 = vsyncpa [#allocation5 + $0x1], 1 }

// kernel: _lambda_.5
= control target key start
LH: loop header
LB: loop body
LE: loop exit
PB: predicated region body
PF: predicated region fallthrough
CT: control target
= control target key end

     0   :  { %s1513_s21 = smov 0   ;;  %s1630_s0 = inlined_call_operand.vmem [shape: f32[1,32], index: 0, kind: input, shape index: {}]   ;;  %s1631_s1 = inlined_call_operand.vmem [shape: f32[2,32,8], index: 1, kind: input, shape index: {}]   ;;  %s1632_s2 = inlined_call_operand.vmem [shape: f32[2,1,8], index: 2, kind: input, shape index: {}]   ;;  %s1633_s3 = inlined_call_operand.vmem [shape: f32[2,40,10], index: 3, kind: input, shape index: {}]   ;;  %s1634_s4 = inlined_call_operand.vmem [shape: f32[2,1,10], index: 4, kind: input, shape index: {}]   ;;  %s1635_s5 = inlined_call_operand.vmem [shape: f32[2,50,16], index: 5, kind: input, shape index: {}]   ;;  %s1636_s6 = inlined_call_operand.vmem [shape: f32[2,1,16], index: 6, kind: input, shape index: {}]   ;;  %s1637_s7 = inlined_call_operand.vmem [shape: f32[2,1,8], index: 7, kind: input, shape index: {}]   ;;  %s1638_s8 = inlined_call_operand.vmem [shape: f32[2,1,10], index: 8, kind: input, shape index: {}]   ;;  %s1639_s9 = inlined_call_operand.vmem [shape: f32[2,1,8], index: 9, kind: output, shape index: {0}]   ;;  %s1640_s10 = inlined_call_operand.vmem [shape: f32[2,1,10], index: 10, kind: output, shape index: {1}]   ;;  %s1641_s11 = inlined_call_operand.vmem [shape: f32[2,1,10], index: 11, kind: output, shape index: {2}]   ;;  %s1642_s12 = inlined_call_operand.vmem [shape: f32[2,1,6], index: 12, kind: output, shape index: {3}]  }
   0x1 LB: > { %s1283_s22 = sadd.s32 4294967295, %s1441_s21   ;;  %p1287_p0 = scmp.ge.s32.totalorder %s1441_s21, 1  ;;  %s1441_s21 = sphi %s1513_s21, %s23_s21  }
   0x2   : > { %p429_p1 = scmp.lt.s32.totalorder %s1441_s21, 3 }
   0x4   : > { %p430_p2 = pnand %p1287_p0, %p429_p1 }
   0x5   : > { %p503_p3 = scmp.lt.s32.totalorder (!%p430_p2), %s1283_s22, 1  ;;  %v1443_v0 = vmov (!%p430_p2), 0.0|0.0   ;;  %vm1444_vm0 = vmmov (!%p430_p2), 0   ;;  %v1445_v1 = vmov (!%p430_p2), 0.0   ;;  %v1537_v8 = vld [vmem:[%s1630_s0] sm:$0x1] (!%p430_p2) }
   0x6   : > { %433 = sbr.rel (%p430_p2) target bundleno = 2489 (0x9b9), region = 56  ;;  %1374 = vmatprep.subr.bf16.mxu0 (!%p430_p2), %v1443_v0  ;;  %1332 = vmatprep.mubr.msk.f32.mxu0 (!%p430_p2), %vm1444_vm0, %v1445_v1  ;;  %vm551_vm1 = vcmask (!%p430_p2), 261120   ;;  %vm625_vm2 = vcmask (!%p430_p2), 57344   ;;  %vm656_vm3 = vcmask (!%p430_p2), 64512   ;;  %vm802_vm4 = vcmask (!%p430_p2), 73728  }
   0x7   : > { %1335 = vmatprep.subr.mxu1 (!%p430_p2), %v1445_v1  ;;  %1337 = vmatprep.mubr.msk.f32.mxu1 (!%p430_p2), %vm1444_vm0, %v1445_v1  ;;  %vm979_vm5 = vcmask (!%p430_p2), 1041408   ;;  %vm1446_vm6 = vmmov (!%p430_p2), 1   ;;  %vm975_vm8 = vcmask (!%p430_p2), 80896   ;;  %vm1067_vm9 = vcmask (!%p430_p2), 122960  }
   0x8   : > { %vm1394_vm7 = vmpackc.low (!%p430_p2), %vm979_vm5, %vm1446_vm6  ;;  %vm1078_vm10 = vcmask (!%p430_p2), 40960  }
   0xd   : > { %s1644_s22 = smov (!%p503_p3, %s1283_s22), 1 }
   0xe   : > { %s1301_s23 = sshll.u32 %s1644_s22, 5  ;;  %s510_s13 = scalar_lea.vmem %s1632_s2, %s1644_s22 }
   0xf   : > { %s507_s26 = scalar_lea.vmem %s1631_s1, %s1301_s23  ;;  %v550_v9 = vld [vmem:[%s510_s13] sm:$0x1]  ;;  %s529_s16 = scalar_lea.vmem %s1637_s7, %s1644_s22 }
  0x10   : > { %v546_v2 = vld [vmem:[%s507_s26] sm:$0xff]  ;;  %v547_v3 = vld [vmem:[%s507_s26 + $0x8] sm:$0xff]  ;;  %v548_v4 = vld [vmem:[%s507_s26 + $0x10] sm:$0xff]  ;;  %s535_s19 = scalar_lea.vmem %s1639_s9, %s1644_s22  ;;  %s1396_s20 = smul.u32 40, %s1644_s22 }
  0x11   : > { %v1375_v5 = vpack.c.bf16 %v547_v3, %v546_v2  ;;  %v549_v6 = vld [vmem:[%s507_s26 + $0x18] sm:$0xff]  ;;  %v637_v21 = vld [vmem:[%s529_s16] sm:$0x1]  ;;  %s1397_s23 = smul.u32 56, %s1644_s22  ;;  %s518_s14 = scalar_lea.vmem %s1634_s4, %s1644_s22 }
  0x12   : > { %v1378_v7 = vpack.c.bf16 %v549_v6, %v548_v4  ;;  %s515_s26 = scalar_lea.vmem %s1633_s3, %s1396_s20  ;;  %v800_v53 = vld [vmem:[%s518_s14] sm:$0x1]  ;;  %s532_s17 = scalar_lea.vmem %s1638_s8, %s1644_s22 }
  0x13   : > { %1376 = vmatpush3.bf16.msra.mxu0 %v1375_v5  ;;  %v655_v31 = vld [vmem:[%s515_s26 + $0x20] sm:$0xff]  ;;  %s1569_s29 = scalar_lea.vmem %s1635_s5, %s1397_s23  ;;  %v652_v35 = vld [vmem:[%s515_s26 + $0x8] sm:$0xff]  ;;  %v653_v39 = vld [vmem:[%s515_s26 + $0x10] sm:$0xff]  ;;  %s538_s20 = scalar_lea.vmem %s1640_s10, %s1644_s22 }
  0x14   : > { %1377 = vmatprep.subr.bf16.mxu0 %v1443_v0  ;;  %1336 = vmatpush3.msra.mxu1 %v655_v31  ;;  %v832_v32 = vld [vmem:[%s1569_s29 + $0x20] sm:$0xff]  ;;  %v654_v40 = vld [vmem:[%s515_s26 + $0x18] sm:$0xff]  ;;  %v829_v43 = vld [vmem:[%s1569_s29 + $0x8] sm:$0xff]  ;;  %s526_s25 = scalar_lea.vmem %s1636_s6, %s1644_s22  ;;  %s544_s14 = scalar_lea.vmem %s1642_s12, %s1644_s22 }
  0x15   : > { %1380 = vmatprep.subr.bf16.mxu1 %v1443_v0  ;;  %v651_v34 = vld [vmem:[%s515_s26] sm:$0xff]  ;;  %v1384_v41 = vpack.c.bf16 %v654_v40, %v653_v39  ;;  %v830_v45 = vld [vmem:[%s1569_s29 + $0x10] sm:$0xff]  ;;  %v831_v46 = vld [vmem:[%s1569_s29 + $0x18] sm:$0xff]  ;;  %s1447_s26 = smov 118  }
  0x16   : > { %v1381_v37 = vpack.c.bf16 %v652_v35, %v651_v34  ;;  %v828_v42 = vld [vmem:[%s1569_s29] sm:$0xff]  ;;  %v1390_v47 = vpack.c.bf16 %v831_v46, %v830_v45 }
  0x17   : > { %1379 = vmatpush3.bf16.msra.mxu0 %v1378_v7  ;;  %v1387_v44 = vpack.c.bf16 %v829_v43, %v828_v42  ;;  %v814_v4 = vld [vmem:[%s532_s17] sm:$0x1] }
  0x18   : > { %1351 = vmatprep.subr.mxu0 %v1445_v1 }
  0x1a   : > { %1333 = vmatmul.mubr.msk.f32.vlgmr.msra.gmra.mrb[0].mxu0 %vm551_vm1, %v1537_v8 }
  0x1b   : > { %1353 = vmatprep.mubr.msk.f32.mxu0 %vm1444_vm0, %v1445_v1  ;;  %1352 = vmatpush3.msra.mxu0 %v832_v32 }
  0x1c   : > { %1392 = vmatprep.subr.bf16.mxu0 %v1443_v0 }
  0xed   : > { %v621_v10 = vpop.f32.mrb[0].mxu0 }
  0xee   : > { %v622_v11 = vadd.f32 %v621_v10, %v550_v9  ;;  %v1334_v12 = vpop.f32.mrb[1].mxu0 }
  0xf0   : > { %v626_v13 = vsel %vm625_vm2, %v622_v11, -inf }
  0xf1   : > { %627 = vmax.xlane.f32.xlu0 %v626_v13 }
 0x17e   : > { %v628_v14 = vpop.xlane.xlu0 %627 }
 0x17f   : > { %v629_v15 = vsub.f32 %v622_v11, %v628_v14  ;;  %v833_v14 = vld [vmem:[%s1569_s29 + $0x28] sm:$0xff] }
 0x181   : > { %v630_v16 = vmul.f32 1.442695, %v629_v15  ;;  %v834_v15 = vld [vmem:[%s1569_s29 + $0x30] sm:$0x3]  ;;  %s541_s29 = scalar_lea.vmem %s1641_s11, %s1644_s22 }
 0x183   : > { %1411 = vpow2.f32 %v630_v16  ;;  %v1393_v16 = vpack.c.bf16 %v834_v15, %v833_v14 }
 0x18d   : > { %v1412_v17 = vpop.eup %1411 }
 0x18e   : > { %v632_v18 = vsel %vm625_vm2, %v1412_v17, 0.0 }
 0x18f   : > { %633 = vadd.xlane.f32.xlu0 %v632_v18 }
 0x21c   : > { %v634_v19 = vpop.xlane.xlu0 %633 }
 0x21d   : > { %1413 = vrcp.f32 %v634_v19 }
 0x227   : > { %v1414_v20 = vpop.eup %1413 }
 0x228   : > { %v636_v22 = vmul.f32 %v1414_v20, %v1412_v17 }
 0x22a   : > { %v638_v23 = vadd.f32 %v637_v21, %v636_v22  ;;  %1084 = vst.msk [vmem:[%s535_s19] sm:$0x1] %vm625_vm2, %v636_v22  ;;  %v1054_v21 = vld [vmem:[%s526_s25] sm:$0x1] }
 0x22c   : > { %v639_v24 = vmul.f32 100.0, %v638_v23 }
 0x22e   : > { %v640_v25 = vsel %vm625_vm2, %v639_v24, -inf }
 0x22f   : > { %641 = vmax.xlane.f32.xlu1 %v640_v25 }
 0x2bc   : > { %v642_v26 = vpop.xlane.xlu1 %641 }
 0x2bd   : > { %v643_v27 = vsub.f32 %v639_v24, %v642_v26 }
 0x2bf   : > { %v644_v28 = vmul.f32 1.442695, %v643_v27 }
 0x2c1   : > { %1415 = vpow2.f32 %v644_v28 }
 0x2cb   : > { %v1416_v29 = vpop.eup %1415 }
 0x2cc   : > { %v646_v30 = vsel %vm625_vm2, %v1416_v29, 0.0 }
 0x2cd   : > { %647 = vadd.xlane.f32.xlu1 %v646_v30 }
 0x35a   : > { %v648_v33 = vpop.xlane.xlu1 %647 }
 0x35b   : > { %1417 = vrcp.f32 %v648_v33 }
 0x365   : > { %v1418_v36 = vpop.eup %1417 }
 0x366   : > { %v650_v38 = vmul.f32 %v1418_v36, %v1416_v29 }
 0x368   : > { %1338 = vmatmul.mubr.msk.f32.vlgmr.msra.gmra.mrb[0].mxu1 %vm656_vm3, %v650_v38  ;;  %1354 = vmatmul.mubr.msk.f32.vlgmr.msra.gmra.mrb[2].mxu0 %vm656_vm3, %v650_v38 }
 0x369   : > { %1382 = vmatpush3.bf16.msra.mxu1 %v1381_v37  ;;  %1348 = vmatprep.mubr.msk.f32.mxu1 %vm1444_vm0, %v1445_v1 }
 0x36a   : > { %1383 = vmatprep.subr.bf16.mxu1 %v1443_v0  ;;  %1371 = vmatprep.mubr.msk.f32.mxu0 %vm1444_vm0, %v1445_v1 }
 0x36b   : > { %1395 = vmatpush3.bf16.msk.msra.mxu0 %vm1394_vm7, %v1393_v16 }
 0x36d   : > { %1385 = vmatpush3.bf16.msra.mxu1 %v1384_v41 }
 0x36e   : > { %1386 = vmatprep.subr.bf16.mxu1 %v1443_v0 }
 0x370   : > { %1349 = vmatmul.mubr.msk.f32.vlgmr.msra.gmra.mrb[2].mxu1 %vm551_vm1, %v1537_v8 }
 0x371   : > { %1388 = vmatpush3.bf16.msra.mxu1 %v1387_v44  ;;  %1364 = vmatprep.mubr.msk.f32.mxu1 %vm1444_vm0, %v1445_v1 }
 0x372   : > { %1389 = vmatprep.subr.bf16.mxu1 %v1443_v0 }
 0x375   : > { %1391 = vmatpush3.bf16.msra.mxu1 %v1390_v47 }
 0x378   : > { %1365 = vmatmul.mubr.msk.f32.vlgmr.msra.gmra.mrb[4].mxu1 %vm551_vm1, %v1537_v8 }
 0x43b   : > { %v726_v48 = vpop.f32.mrb[0].mxu1  ;;  %v901_v49 = vpop.f32.mrb[2].mxu0 }
 0x43c   : > { %v1339_v50 = vpop.f32.mrb[1].mxu1  ;;  %v1355_v51 = vpop.f32.mrb[3].mxu0 }
 0x443   : > { %v796_v52 = vpop.f32.mrb[2].mxu1 }
 0x444   : > { %v797_v54 = vadd.f32 %v796_v52, %v726_v48  ;;  %v1350_v55 = vpop.f32.mrb[3].mxu1 }
 0x446   : > { %v801_v56 = vadd.f32 %v800_v53, %v797_v54 }
 0x448   : > { %v803_v57 = vsel %vm802_vm4, %v801_v56, -inf }
 0x449   : > { %804 = vmax.xlane.f32.xlu0 %v803_v57 }
 0x44b   : > { %v971_v58 = vpop.f32.mrb[4].mxu1 }
 0x44c   : > { %v972_v59 = vadd.f32 %v971_v58, %v901_v49  ;;  %v1366_v60 = vpop.f32.mrb[5].mxu1 }
 0x4d6   : > { %v805_v61 = vpop.xlane.xlu0 %804 }
 0x4d7   : > { %v806_v62 = vsub.f32 %v801_v56, %v805_v61 }
 0x4d9   : > { %v807_v63 = vmul.f32 1.442695, %v806_v62 }
 0x4db   : > { %1419 = vpow2.f32 %v807_v63 }
 0x4e5   : > { %v1420_v0 = vpop.eup %1419 }
 0x4e6   : > { %v809_v1 = vsel %vm802_vm4, %v1420_v0, 0.0 }
 0x4e7   : > { %810 = vadd.xlane.f32.xlu1 %v809_v1 }
 0x574   : > { %v811_v2 = vpop.xlane.xlu1 %810 }
 0x575   : > { %1421 = vrcp.f32 %v811_v2 }
 0x57f   : > { %v1422_v3 = vpop.eup %1421 }
 0x580   : > { %v813_v5 = vmul.f32 %v1422_v3, %v1420_v0 }
 0x582   : > { %v815_v6 = vadd.f32 %v814_v4, %v813_v5  ;;  %1085 = vst.msk [vmem:[%s538_s20] sm:$0x1] %vm802_vm4, %v813_v5 }
 0x584   : > { %v816_v7 = vmul.f32 100.0, %v815_v6 }
 0x586   : > { %v817_v8 = vsel %vm802_vm4, %v816_v7, -inf }
 0x587   : > { %818 = vmax.xlane.f32.xlu0 %v817_v8 }
 0x614   : > { %v819_v9 = vpop.xlane.xlu0 %818 }
 0x615   : > { %v820_v10 = vsub.f32 %v816_v7, %v819_v9 }
 0x617   : > { %v821_v11 = vmul.f32 1.442695, %v820_v10 }
 0x619   : > { %1423 = vpow2.f32 %v821_v11 }
 0x623   : > { %v1424_v12 = vpop.eup %1423 }
 0x624   : > { %v823_v13 = vsel %vm802_vm4, %v1424_v12, 0.0 }
 0x625   : > { %824 = vadd.xlane.f32.xlu1 %v823_v13 }
 0x6b2   : > { %v825_v17 = vpop.xlane.xlu1 %824 }
 0x6b3   : > { %1425 = vrcp.f32 %v825_v17 }
 0x6bd   : > { %v1426_v18 = vpop.eup %1425 }
 0x6be   : > { %v827_v19 = vmul.f32 %v1426_v18, %v1424_v12 }
 0x6c0   : > { %1372 = vmatmul.mubr.msk.f32.vlgmr.msra.gmra.mrb[4].mxu0 %vm975_vm8, %v827_v19 }
 0x793   : > { %v1049_v20 = vpop.f32.mrb[4].mxu0 }
 0x794   : > { %v1053_v22 = vadd.f32 %v1049_v20, %v972_v59  ;;  %v1373_v23 = vpop.f32.mrb[5].mxu0 }
 0x796   : > { %v1055_v24 = vadd.f32 %v1054_v21, %v1053_v22 }
 0x798   : > { %v1068_v25 = vsel %vm1067_vm9, %v1055_v24, -inf  ;;  %v1056_v26 = vsel %vm802_vm4, %v1055_v24, -inf }
 0x799   : > { %1069 = vmax.xlane.f32.xlu0 %v1068_v25 }
 0x79d   : > { %1057 = vmax.xlane.f32.xlu0 %v1056_v26 }
 0x826   : > { %v1070_v27 = vpop.xlane.xlu0 %1069 }
 0x827   : > { %v1071_v28 = vsub.f32 %v1055_v24, %v1070_v27 }
 0x829   : > { %v1072_v29 = vmul.f32 1.442695, %v1071_v28 }
 0x82a   : > { %v1058_v31 = vpop.xlane.xlu0 %1057 }
 0x82b   : > { %1427 = vpow2.f32 %v1072_v29  ;;  %v1059_v32 = vsub.f32 %v1055_v24, %v1058_v31 }
 0x82d   : > { %v1060_v33 = vmul.f32 1.442695, %v1059_v32 }
 0x82f   : > { %1429 = vpow2.f32 %v1060_v33 }
 0x835   : > { %v1428_v30 = vpop.eup %1427 }
 0x836   : > { %1075 = vrot.lane.b32.xlu1 %v1428_v30, %s1447_s26 }
 0x839   : > { %v1430_v36 = vpop.eup %1429 }
 0x83a   : > { %v1062_v37 = vsel %vm802_vm4, %v1430_v36, 0.0 }
 0x8a8   : > { %v1076_v34 = vpop.permute.xlu1 %1075 }
 0x8a9   : > { %v1079_v35 = vsel %vm1078_vm10, %v1076_v34, 0.0 }
 0x8aa   : > { %1080 = vadd.xlane.f32.xlu0 %v1079_v35 }
 0x8ae   : > { %1063 = vadd.xlane.f32.xlu0 %v1062_v37 }
 0x937   : > { %v1081_v38 = vpop.xlane.xlu0 %1080 }
 0x938   : > { %1431 = vrcp.f32 %v1081_v38 }
 0x93b   : > { %v1064_v39 = vpop.xlane.xlu0 %1063 }
 0x93c   : > { %1433 = vrcp.f32 %v1064_v39 }
 0x942   : > { %v1432_v40 = vpop.eup %1431 }
 0x943   : > { %v1083_v41 = vmul.f32 %v1432_v40, %v1428_v30 }
 0x945   : > { %1088 = vrot.lane.b32.xlu0 %v1083_v41, %s1447_s26 }
 0x946   : > { %v1434_v42 = vpop.eup %1433 }
 0x947   : > { %v1066_v43 = vmul.f32 %v1434_v42, %v1430_v36 }
 0x949   : > { %1086 = vst.msk [vmem:[%s541_s29] sm:$0x1] %vm802_vm4, %v1066_v43 }
 0x9b7   : > { %v1089_v44 = vpop.permute.xlu0 %1088 }
 0x9b8   : > { %1091 = vst.msk [vmem:[%s544_s14] sm:$0x1] %vm1078_vm10, %v1089_v44 }
 0x9b9 PF: > { %s23_s21 = sadd.s32 1, %s1441_s21  }
 0x9ba   : > { %p20_p4 = scmp.ge.s32.totalorder %s23_s21, 4  }
 0x9bc   :  { %22 = sbr.rel (!%p20_p4) target bundleno = 1 (0x1), region = 143 }

// kernel: _lambda_.4
= control target key start
LH: loop header
LB: loop body
LE: loop exit
PB: predicated region body
PF: predicated region fallthrough
CT: control target
= control target key end

     0   :  { %s2306_s0 = inlined_call_operand.vmem [shape: f32[8,16], index: 0, kind: input, shape index: {}]   ;;  %s2307_s1 = inlined_call_operand.vmem [shape: f32[5,8,16], index: 1, kind: input, shape index: {}]   ;;  %s2308_s2 = inlined_call_operand.vmem [shape: f32[5,1,1], index: 2, kind: input, shape index: {}]   ;;  %s2309_s3 = inlined_call_operand.vmem [shape: f32[1,48], index: 3, kind: input, shape index: {}]   ;;  %s2310_s4 = inlined_call_operand.vmem [shape: f32[48,32], index: 4, kind: input, shape index: {}]   ;;  %s2311_s5 = inlined_call_operand.vmem [shape: f32[1,32], index: 5, kind: input, shape index: {}]   ;;  %s2312_s6 = inlined_call_operand.vmem [shape: f32[3,24], index: 6, kind: input, shape index: {}]   ;;  %s2313_s7 = inlined_call_operand.vmem [shape: f32[24,32], index: 7, kind: input, shape index: {}]   ;;  %s2314_s8 = inlined_call_operand.vmem [shape: f32[1,32], index: 8, kind: input, shape index: {}]   ;;  %s2315_s9 = inlined_call_operand.vmem [shape: f32[32,2], index: 9, kind: input, shape index: {}]   ;;  %s2316_s10 = inlined_call_operand.vmem [shape: f32[1,2], index: 10, kind: input, shape index: {}]   ;;  %s2317_s11 = inlined_call_operand.vmem [shape: f32[16,32], index: 11, kind: input, shape index: {}]   ;;  %s2318_s12 = inlined_call_operand.vmem [shape: f32[1,32], index: 12, kind: input, shape index: {}]   ;;  %s2319_s13 = inlined_call_operand.vmem [shape: f32[64,1], index: 13, kind: input, shape index: {}]   ;;  %s2320_s14 = inlined_call_operand.<no memory space> [shape: f32[1,1], index: 14, kind: input, shape index: {}]   ;;  %s2321_s15 = inlined_call_operand.vmem [shape: f32[1,56], index: 15, kind: input, shape index: {}]   ;;  %s2322_s16 = inlined_call_operand.vmem [shape: f32[1,32], index: 16, kind: input, shape index: {}]   ;;  %s2323_s17 = inlined_call_operand.vmem [shape: f32[1,32], index: 17, kind: input, shape index: {}]   ;;  %s2324_s18 = inlined_call_operand.vmem [shape: f32[56,128], index: 18, kind: input, shape index: {}]   ;;  %s2325_s19 = inlined_call_operand.vmem [shape: f32[32,128], index: 19, kind: input, shape index: {}]   ;;  %s2326_s20 = inlined_call_operand.vmem [shape: f32[1,128], index: 20, kind: input, shape index: {}]   ;;  %s2327_s21 = inlined_call_operand.vmem [shape: f32[128,32], index: 21, kind: input, shape index: {}]   ;;  %s2328_s22 = inlined_call_operand.vmem [shape: f32[1,32], index: 22, kind: input, shape index: {}]   ;;  %s2329_s23 = inlined_call_operand.vmem [shape: f32[1,32], index: 23, kind: output, shape index: {0}]   ;;  %s2330_s24 = inlined_call_operand.hbm [shape: f32[1,32], index: 24, kind: output, shape index: {1}]   ;;  %s2331_s25 = inlined_call_operand.hbm [shape: f32[1,32], index: 25, kind: output, shape index: {2}]  }
   0x1   :  { %2337 = sst [smem:[#allocation9_spill]] %s2306_s0  ;;  %v31_v0 = vstv %s2320_s14 }
   0x2   :  { %2338 = sst [smem:[#allocation10_spill]] %s2307_s1  ;;  %32 = vst [vmem:[#allocation2] sm:$0x1] %v31_v0 }
   0x3   :  { %2339 = sst [smem:[#allocation11_spill]] %s2308_s2 }
   0x4   :  { %2340 = sst [smem:[#allocation12_spill]] %s2309_s3 }
   0x5   :  { %2341 = sst [smem:[#allocation13_spill]] %s2310_s4 }
   0x6   :  { %2342 = sst [smem:[#allocation14_spill]] %s2311_s5 }
   0x7   :  { %2343 = sst [smem:[#allocation15_spill]] %s2312_s6 }
   0x8   :  { %2344 = sst [smem:[#allocation16_spill]] %s2313_s7 }
   0x9   :  { %2345 = sst [smem:[#allocation17_spill]] %s2314_s8 }
   0xa   :  { %2346 = sst [smem:[#allocation18_spill]] %s2315_s9 }
   0xb   :  { %33 = vsyncpa [#allocation4], 0  ;;  %s2347_s7 = sld [smem:[#allocation11_spill]]  ;;  %v1835_v3 = vmov 0  }
   0xc   :  { %1768 = vset.pattern.permute.xlu1 %v1835_v3  ;;  %1767 = vset.pattern.permute.xlu0 %v1835_v3 }
  0x11   :  { %v1450_v1 = vld [vmem:[%s2347_s7 + $0x2] ss:$0 sm:$0xff]  ;;  %v1444_v2 = vld [vmem:[%s2347_s7] ss:$0 sm:$0xff] }
  0x12   :  { %119 = vperm.xlu1 %1768, %v1450_v1   ;;  %90 = vperm.xlu0 %1767, %v1444_v2  }
  0x13   :  { %34 = vsyncpa [#allocation6], 0  ;;  %v1453_v4 = vld [vmem:[%s2347_s7 + $0x3] ss:$0 sm:$0xff]  ;;  %v1447_v5 = vld [vmem:[%s2347_s7 + $0x1] ss:$0 sm:$0xff] }
  0x14   :  { %v1456_v6 = vld [vmem:[%s2347_s7 + $0x4] ss:$0 sm:$0xff]  ;;  %s2348_s0 = sld [smem:[#allocation18_spill]]  ;;  %v1836_v9 = vmov 0.0|0.0   ;;  %vm1837_vm0 = vmmov 0   ;;  %v1838_v11 = vmov 0.0  }
  0x15   :  { %1685 = vmatprep.subr.bf16.mxu1 %v1836_v9  ;;  %1545 = vmatprep.mubr.msk.f32.mxu1 %vm1837_vm0, %v1838_v11  ;;  %s2349_s7 = sld [smem:[#allocation10_spill]]  ;;  %s2350_s14 = sld [smem:[#allocation9_spill]]  ;;  %vm154_vm1 = vcmask 130048   ;;  %v319_v52 = vld [vmem:[%s2316_s10] sm:$0x1]  ;;  %vm321_vm2 = vcmask 8192  }
  0x16   :  { %134 = vperm.xlu1 %1768, %v1453_v4   ;;  %104 = vperm.xlu0 %1767, %v1447_v5   ;;  %v1839_v62 = vmov 1   ;;  %v430_v1 = vld [vmem:[%s2317_s11] sm:$0xff]  ;;  %v431_v2 = vld [vmem:[%s2317_s11 + $0x8] sm:$0xff]  ;;  %s2351_s4 = sld [smem:[#allocation13_spill]]  ;;  %s2352_s10 = sld [smem:[#allocation16_spill]]  ;;  %vm520_vm3 = vcmask 195584  }
  0x17   :  { %1691 = vmatprep.subr.bf16.mxu0 %v1836_v9  ;;  %1567 = vmatprep.mubr.msk.f32.mxu0 %vm1837_vm0, %v1838_v11  ;;  %v1701_v4 = vpack.c.bf16 %v431_v2, %v430_v1  ;;  %s2353_s2 = sld [smem:[#allocation15_spill]]  ;;  %vm353_vm4 = vcmask 392192   ;;  %vm605_vm6 = vcmask 261120   ;;  %s2355_s30 = sld [smem:[#allocation17_spill]]  ;;  %vm821_vm8 = vcmask 1042432  }
  0x18   :  { %vm765_vm9 = vcmask 2048   ;;  %vm817_vm10 = vcmask 23552   ;;  %vm980_vm11 = vcmask 457728   ;;  %s1841_s28 = smov 32   ;;  %vm1093_vm13 = vcmask 253952  }
  0x1a   :  { %149 = vperm.xlu0 %1767, %v1456_v6   ;;  %v171_v7 = vld [vmem:[%s2348_s0 + $0x10] sm:$0xff]  ;;  %v172_v8 = vld [vmem:[%s2348_s0 + $0x18] sm:$0xff]  ;;  %v169_v42 = vld [vmem:[%s2348_s0] sm:$0xff]  ;;  %1769 = vset.pattern.permute.xlu1 %v1839_v62 }
  0x1b   :  { %v1686_v10 = vpack.c.bf16 %v172_v8, %v171_v7  ;;  %v83_v14 = vld [vmem:[%s2349_s7] sm:$0xff]  ;;  %v1446_v15 = vld [vmem:[%s2349_s7 + $0x8] sm:$0xff]  ;;  %v1449_v17 = vld [vmem:[%s2349_s7 + $0x10] sm:$0xff] }
  0x1c   :  { %v81_v16 = vld [vmem:[%s2350_s14] sm:$0xff]  ;;  %v1452_v22 = vld [vmem:[%s2349_s7 + $0x18] sm:$0xff]  ;;  %v170_v43 = vld [vmem:[%s2348_s0 + $0x8] sm:$0xff]  ;;  %s1840_s14 = smov 64  }
  0x1d   :  { %1687 = vmatpush3.bf16.msra.mxu1 %v1686_v10  ;;  %v155_v21 = vsel %vm154_vm1, %v81_v16, 0.0  ;;  %v1455_v26 = vld [vmem:[%s2349_s7 + $0x20] sm:$0xff]  ;;  %v1689_v46 = vpack.c.bf16 %v170_v43, %v169_v42  ;;  %v347_v6 = vld [vmem:[%s2351_s4 + $0x8] sm:$0xff]  ;;  %v348_v7 = vld [vmem:[%s2351_s4 + $0x10] sm:$0xff] }
  0x1e   :  { %1688 = vmatprep.subr.bf16.mxu1 %v1836_v9  ;;  %v156_v28 = vrot.slane %v155_v21, 4  ;;  %v346_v5 = vld [vmem:[%s2351_s4] sm:$0xff]  ;;  %v349_v10 = vld [vmem:[%s2351_s4 + $0x18] sm:$0xff] }
  0x1f   :  { %v1692_v8 = vpack.c.bf16 %v347_v6, %v346_v5  ;;  %v510_v16 = vld [vmem:[%s2352_s10] sm:$0xff] }
  0x20   :  { %v157_v33 = vadd.f32 %v156_v28, %v155_v21 }
  0x21   :  { %1693 = vmatpush3.bf16.msra.mxu0 %v1692_v8 }
  0x22   :  { %v158_v37 = vrot.slane %v157_v33, 2  ;;  %1694 = vmatprep.subr.bf16.mxu0 %v1836_v9 }
  0x24   :  { %v159_v40 = vadd.f32 %v158_v37, %v157_v33  ;;  %v601_v33 = vld [vmem:[%s2319_s13 + $0x20] sm:$0xff]  ;;  %v604_v37 = vld [vmem:[%s2319_s13 + $0x38] sm:$0xff] }
  0x26   :  { %v160_v45 = vrot.slane %v159_v40, 1 }
  0x28   :  { %v161_v48 = vadd.f32 %v160_v45, %v159_v40 }
  0x91   :  { %v120_v12 = vpop.permute.xlu1 %119  ;;  %v91_v13 = vpop.permute.xlu0 %90 }
  0x92   :  { %v93_v19 = vmul.f32 %v91_v13, %v83_v14  ;;  %v122_v24 = vmul.f32 %v1449_v17, %v120_v12  ;;  %v1695_v12 = vpack.c.bf16 %v349_v10, %v348_v7  ;;  %v350_v13 = vld [vmem:[%s2351_s4 + $0x20] sm:$0xff]  ;;  %v351_v14 = vld [vmem:[%s2351_s4 + $0x28] sm:$0xff] }
  0x93   :  { %v511_v17 = vld [vmem:[%s2352_s10 + $0x8] sm:$0xff] }
  0x94   :  { %1696 = vmatpush3.bf16.msra.mxu0 %v1695_v12 }
  0x95   :  { %v105_v18 = vpop.permute.xlu0 %104  ;;  %v135_v23 = vpop.permute.xlu1 %134  ;;  %1697 = vmatprep.subr.bf16.mxu0 %v1836_v9 }
  0x96   :  { %v107_v20 = vmul.f32 %v1446_v15, %v105_v18  ;;  %v137_v29 = vmul.f32 %v1452_v22, %v135_v23  ;;  %v1698_v15 = vpack.c.bf16 %v351_v14, %v350_v13  ;;  %v1704_v22 = vpack.c.bf16 %v511_v17, %v510_v16 }
  0x98   :  { %v108_v25 = vadd.f32 %v107_v20, %v93_v19  ;;  %1699 = vmatpush3.bf16.msra.mxu0 %v1698_v15 }
  0x99   :  { %v150_v27 = vpop.permute.xlu0 %149  ;;  %1712 = vmatprep.subr.bf16.mxu0 %v1836_v9 }
  0x9a   :  { %v123_v30 = vadd.f32 %v122_v24, %v108_v25  ;;  %v152_v32 = vmul.f32 %v1455_v26, %v150_v27  ;;  %v597_v24 = vld [vmem:[%s2319_s13] sm:$0xff]  ;;  %v598_v25 = vld [vmem:[%s2319_s13 + $0x8] sm:$0xff]  ;;  %v512_v26 = vld [vmem:[%s2352_s10 + $0x10] sm:$0xff]  ;;  %s2354_s10 = sld [smem:[#allocation12_spill]] }
  0x9b   :  { %v509_v27 = vld [vmem:[%s2353_s2] sm:$0x7]  ;;  %v1707_v28 = vpack.c.bf16 %v598_v25, %v597_v24  ;;  %v905_v24 = vld [vmem:[%s2325_s19 + $0x10] sm:$0xff]  ;;  %v906_v25 = vld [vmem:[%s2325_s19 + $0x18] sm:$0xff]  ;;  %s1842_s2 = smov 96  }
  0x9c   :  { %v138_v31 = vadd.f32 %v137_v29, %v123_v30  ;;  %v599_v29 = vld [vmem:[%s2319_s13 + $0x10] sm:$0xff]  ;;  %v600_v30 = vld [vmem:[%s2319_s13 + $0x18] sm:$0xff] }
  0x9e   :  { %v153_v34 = vadd.f32 %v152_v32, %v138_v31  ;;  %v1710_v32 = vpack.c.bf16 %v600_v30, %v599_v29  ;;  %v1105_v29 = vld [vmem:[%s2327_s21 + $0x28] sm:$0xff]  ;;  %v1106_v30 = vld [vmem:[%s2327_s21 + $0x30] sm:$0xff] }
  0xa0   :  { %v162_v35 = vsel %vm154_vm1, %v153_v34, 0.0  ;;  %v345_v31 = vld [vmem:[%s2354_s10] sm:$0x1]  ;;  %v602_v34 = vld [vmem:[%s2319_s13 + $0x28] sm:$0xff] }
  0xa1   :  { %v163_v36 = vrot.slane %v162_v35, 4  ;;  %1568 = vmatmul.mubr.msk.f32.vlgmr.msra.gmra.mrb[0].mxu0 %vm353_vm4, %v345_v31 }
  0xa2   :  { %1605 = vmatprep.mubr.msk.f32.mxu0 %vm1837_vm0, %v1838_v11 }
  0xa3   :  { %v164_v38 = vadd.f32 %v163_v36, %v162_v35  ;;  %v1713_v35 = vpack.c.bf16 %v602_v34, %v601_v33  ;;  %v603_v36 = vld [vmem:[%s2319_s13 + $0x30] sm:$0xff]  ;;  %v895_v34 = vld [vmem:[%s2324_s18] sm:$0xff] }
  0xa5   :  { %v165_v39 = vrot.slane %v164_v38, 2  ;;  %1714 = vmatpush3.bf16.msra.mxu0 %v1713_v35  ;;  %v896_v35 = vld [vmem:[%s2324_s18 + $0x8] sm:$0xff] }
  0xa6   :  { %1715 = vmatprep.subr.bf16.mxu0 %v1836_v9 }
  0xa7   :  { %v166_v41 = vadd.f32 %v165_v39, %v164_v38  ;;  %v1716_v38 = vpack.c.bf16 %v604_v37, %v603_v36  ;;  %v432_v39 = vld [vmem:[%s2318_s12] sm:$0x1]  ;;  %v1725_v36 = vpack.c.bf16 %v896_v35, %v895_v34  ;;  %v897_v37 = vld [vmem:[%s2324_s18 + $0x10] sm:$0xff] }
  0xa9   :  { %v167_v44 = vrot.slane %v166_v41, 1  ;;  %1717 = vmatpush3.bf16.msra.mxu0 %v1716_v38  ;;  %v898_v38 = vld [vmem:[%s2324_s18 + $0x18] sm:$0xff] }
  0xaa   :  { %1718 = vmatprep.subr.bf16.mxu0 %v1836_v9 }
  0xab   :  { %v168_v47 = vadd.f32 %v167_v44, %v166_v41  ;;  %v1461_v44 = vld [vmem:[%s2355_s30] ss:$0 sm:$0xff]  ;;  %s1844_s30 = smov [#allocation5]  }
  0xac   :  { %s1430_s12 = sshll.u32 %s1844_s30, 4  ;;  %s1431_s12 = int_to_ptr.vmem [resolvable:$true] %s1430_s12 }
  0xad   :  { %1546 = vmatmul.mubr.msk.f32.vlgmr.msra.gmra.mrb[0].mxu1 %vm154_vm1, %v168_v47 }
  0xae   :  { %1690 = vmatpush3.bf16.msra.mxu1 %v1689_v46  ;;  %1552 = vmatprep.mubr.msk.f32.mxu1 %vm1837_vm0, %v1838_v11 }
  0xaf   :  { %1700 = vmatprep.subr.bf16.mxu1 %v1836_v9 }
  0xb1   :  { %1553 = vmatmul.mubr.msk.f32.vlgmr.msra.gmra.mrb[2].mxu1 %vm154_vm1, %v161_v48 }
  0xb2   :  { %1574 = vmatprep.mubr.msk.f32.mxu1 %vm1837_vm0, %v1838_v11  ;;  %1702 = vmatpush3.bf16.msra.mxu1 %v1701_v4 }
  0xb3   :  { %1703 = vmatprep.subr.bf16.mxu1 %v1836_v9 }
 0x180   :  { %v242_v49 = vpop.f32.mrb[0].mxu1 }
 0x181   :  { %v1547_v50 = vpop.f32.mrb[1].mxu1 }
 0x184   :  { %v315_v51 = vpop.f32.mrb[2].mxu1 }
 0x185   :  { %v316_v53 = vadd.f32 %v315_v51, %v242_v49  ;;  %v1554_v54 = vpop.f32.mrb[3].mxu1  ;;  %v2138_v51 = vpop.f32.mrb[0].mxu0 }
 0x187   :  { %v320_v55 = vadd.f32 %v319_v52, %v316_v53  ;;  %v1569_v52 = vpop.f32.mrb[1].mxu0  ;;  %v752_v53 = vlaneseq }
 0x188   :  { %v1110_v52 = vld [vmem:[%s2327_s21 + $0x50] sm:$0xff] }
 0x189   :  { %v322_v56 = vsel %vm321_vm2, %v320_v55, -inf  ;;  %v753_v54 = vshrl.u32 %v752_v53, 7  ;;  %v1111_v53 = vld [vmem:[%s2327_s21 + $0x58] sm:$0xff] }
 0x18a   :  { %323 = vmax.xlane.f32.xlu1 %v322_v56 }
 0x18b   :  { %v754_v56 = vsub.s32 0, %v753_v54 }
 0x217   :  { %v324_v57 = vpop.xlane.xlu1 %323 }
 0x218   :  { %v325_v58 = vsub.f32 %v320_v55, %v324_v57 }
 0x21a   :  { %v326_v59 = vmul.f32 1.442695, %v325_v58 }
 0x21c   :  { %1771 = vpow2.f32 %v326_v59 }
 0x226   :  { %v1772_v60 = vpop.eup %1771 }
 0x227   :  { %v328_v61 = vsel %vm321_vm2, %v1772_v60, 0.0 }
 0x228   :  { %329 = vadd.xlane.f32.xlu0 %v328_v61 }
 0x2b5   :  { %v330_v63 = vpop.xlane.xlu0 %329 }
 0x2b6   :  { %1773 = vrcp.f32 %v330_v63 }
 0x2c0   :  { %v1774_v0 = vpop.eup %1773 }
 0x2c1   :  { %v332_v3 = vmul.f32 %v1774_v0, %v1772_v60  ;;  %v1465_v60 = vld [vmem:[#allocation2] ss:$0 sm:$0xff] }
 0x2c3   :  { %340 = vperm.xlu1 %1769, %v332_v3   ;;  %335 = vperm.xlu0 %1767, %v332_v3  }
 0x2c7   :  { %1770 = vset.pattern.permute.xlu0 %v1839_v62 }
 0x342   :  { %v341_v18 = vpop.permute.xlu1 %340  ;;  %v336_v19 = vpop.permute.xlu0 %335 }
 0x343   :  { %v343_v20 = vmul.f32 %v341_v18, %v168_v47  ;;  %v338_v21 = vmul.f32 %v336_v19, %v161_v48 }
 0x345   :  { %v344_v23 = vadd.f32 %v343_v20, %v338_v21  ;;  %v903_v21 = vld [vmem:[%s2325_s19] sm:$0xff] }
 0x347   :  { %1575 = vmatmul.mubr.msk.f32.vlgmr.msra.gmra.mrb[4].mxu1 %vm154_vm1, %v344_v23 }
 0x348   :  { %1705 = vmatpush3.bf16.msra.mxu1 %v1704_v22  ;;  %1583 = vmatprep.mubr.msk.f32.mxu1 %vm1837_vm0, %v1838_v11  ;;  %v904_v22 = vld [vmem:[%s2325_s19 + $0x8] sm:$0xff]  ;;  %s2356_s19 = sld [smem:[#allocation14_spill]] }
 0x349   :  { %1581 = vmatprep.subr.mxu1 %v1838_v11  ;;  %v1719_v23 = vpack.c.bf16 %v904_v22, %v903_v21 }
 0x34c   :  { %1582 = vmatpush3.msra.mxu1 %v512_v26  ;;  %v1722_v26 = vpack.c.bf16 %v906_v25, %v905_v24 }
 0x34d   :  { %1584 = vmatmul.mubr.msk.f32.vlgmr.msra.gmra.mrb[6].mxu1 %vm520_vm3, %v509_v27  ;;  %1706 = vmatprep.subr.bf16.mxu1 %v1836_v9  ;;  %v902_v27 = vld [vmem:[%s2322_s16] sm:$0x1] }
 0x34e   :  { %1708 = vmatpush3.bf16.msra.mxu1 %v1707_v28  ;;  %1594 = vmatprep.mubr.msk.f32.mxu1 %vm1837_vm0, %v1838_v11  ;;  %v1104_v28 = vld [vmem:[%s2327_s21 + $0x20] sm:$0xff] }
 0x34f   :  { %1709 = vmatprep.subr.bf16.mxu1 %v1836_v9  ;;  %v1734_v31 = vpack.c.bf16 %v1105_v29, %v1104_v28  ;;  %v1112_v28 = vld [vmem:[%s2327_s21 + $0x60] sm:$0xff]  ;;  %v1113_v29 = vld [vmem:[%s2327_s21 + $0x68] sm:$0xff] }
 0x352   :  { %1711 = vmatpush3.bf16.msra.mxu1 %v1710_v32  ;;  %v1107_v32 = vld [vmem:[%s2327_s21 + $0x38] sm:$0xff] }
 0x353   :  { %1608 = vmatprep.subr.mxu1 %v1838_v11  ;;  %v1737_v33 = vpack.c.bf16 %v1107_v32, %v1106_v30  ;;  %v1114_v30 = vld [vmem:[%s2327_s21 + $0x70] sm:$0xff]  ;;  %v1115_v32 = vld [vmem:[%s2327_s21 + $0x78] sm:$0xff] }
 0x41a   :  { %v502_v40 = vpop.f32.mrb[4].mxu1 }
 0x41b   :  { %v503_v41 = vadd.f32 %v502_v40, %v432_v39  ;;  %v1576_v42 = vpop.f32.mrb[5].mxu1  ;;  %v1728_v40 = vpack.c.bf16 %v898_v38, %v897_v37 }
 0x41c   :  { %v900_v42 = vld [vmem:[%s2324_s18 + $0x28] sm:$0xff] }
 0x41d   :  { %vm506_vm5 = vcmp.ge.f32.partialorder %v503_v41, 0.0  ;;  %v507_v43 = vmul.f32 0.25, %v503_v41 }
 0x41f   :  { %v2128_v45 = vsel %vm506_vm5, %v503_v41, %v507_v43  ;;  %v899_v41 = vld [vmem:[%s2324_s18 + $0x20] sm:$0xff] }
 0x420   :  { %v590_v46 = vpop.f32.mrb[6].mxu1  ;;  %1595 = vmatmul.mubr.msk.f32.vlgmr.msra.gmra.mrb[8].mxu1 %vm605_vm6, %v2128_v45  ;;  %v1731_v43 = vpack.c.bf16 %v900_v42, %v899_v41 }
 0x421   :  { %v591_v47 = vadd.f32 %v1461_v44, %v590_v46  ;;  %v1585_v48 = vpop.f32.mrb[7].mxu1  ;;  %1610 = vmatprep.mubr.msk.f32.mxu1 %vm1837_vm0, %v1838_v11  ;;  %v1108_v44 = vld [vmem:[%s2327_s21 + $0x40] sm:$0xff]  ;;  %v1109_v46 = vld [vmem:[%s2327_s21 + $0x48] sm:$0xff] }
 0x422   :  { %v901_v48 = vld [vmem:[%s2324_s18 + $0x30] sm:$0xff] }
 0x423   :  { %vm594_vm7 = vcmp.ge.f32.partialorder %v591_v47, 0.0  ;;  %v595_v49 = vmul.f32 0.25, %v591_v47 }
 0x425   :  { %v596_v50 = vsel %vm594_vm7, %v591_v47, %v595_v49  ;;  %v352_v47 = vld [vmem:[%s2356_s19] sm:$0x1] }
 0x426   :  { %1606 = vmatmul.mubr.msk.f32.vlgmr.msra.gmra.mrb[2].mxu0 %vm605_vm6, %v596_v50  ;;  %1609 = vmatpush3.msk.msra.mxu1 %vm821_vm8, %v596_v50  ;;  %v894_v49 = vld [vmem:[%s2321_s15] sm:$0x1]  ;;  %v1746_v50 = vpack.c.bf16 %v1109_v46, %v1108_v44  ;;  %v424_v54 = vadd.f32 %v2138_v51, %v352_v47 }
 0x427   :  { %1724 = vmatprep.subr.bf16.mxu1 %v1836_v9  ;;  %1621 = vmatprep.mubr.msk.f32.mxu0 %vm1837_vm0, %v1838_v11  ;;  %v1100_v51 = vld [vmem:[%s2327_s21] sm:$0xff] }
 0x428   :  { %1720 = vmatpush3.bf16.msra.mxu0 %v1719_v23  ;;  %vm427_vm12 = vcmp.ge.f32.partialorder %v424_v54, 0.0 }
 0x429   :  { %1721 = vmatprep.subr.bf16.mxu0 %v1836_v9 }
 0x42c   :  { %1723 = vmatpush3.bf16.msra.mxu0 %v1722_v26 }
 0x42d   :  { %1733 = vmatprep.subr.bf16.mxu0 %v1836_v9 }
 0x42f   :  { %1622 = vmatmul.mubr.msk.f32.vlgmr.msra.gmra.mrb[4].mxu0 %vm605_vm6, %v902_v27 }
 0x430   :  { %1649 = vmatprep.mubr.msk.f32.mxu0 %vm1837_vm0, %v1838_v11  ;;  %1735 = vmatpush3.bf16.msra.mxu0 %v1734_v31  ;;  %v1752_v31 = vpack.c.bf16 %v1113_v29, %v1112_v28 }
 0x431   :  { %1736 = vmatprep.subr.bf16.mxu0 %v1836_v9 }
 0x434   :  { %1738 = vmatpush3.bf16.msra.mxu0 %v1737_v33  ;;  %v1755_v33 = vpack.c.bf16 %v1115_v32, %v1114_v30 }
 0x435   :  { %1739 = vmatprep.subr.bf16.mxu0 %v1836_v9 }
 0x4f3   :  { %v675_v55 = vpop.f32.mrb[8].mxu1 }
 0x4f4   :  { %v1596_v57 = vpop.f32.mrb[9].mxu1  ;;  %v755_v58 = vrot.slane %v675_v55, %v754_v56  ;;  %v1749_v55 = vpack.c.bf16 %v1111_v53, %v1110_v52  ;;  %v428_v56 = vmul.f32 0.25, %v424_v54 }
 0x4f6   :  { %v429_v57 = vsel %vm427_vm12, %v424_v54, %v428_v56 }
 0x4f9   :  { %v748_v59 = vpop.f32.mrb[2].mxu0 }
 0x4fa   :  { %v756_v61 = vadd.f32 %v755_v58, %v748_v59  ;;  %v1607_v62 = vpop.f32.mrb[3].mxu0 }
 0x4fb   :  { %v1102_v62 = vld [vmem:[%s2327_s21 + $0x10] sm:$0xff] }
 0x4fc   :  { %v764_v63 = vadd.f32 %v1465_v60, %v756_v61  ;;  %v1101_v60 = vld [vmem:[%s2327_s21 + $0x8] sm:$0xff] }
 0x4fd   :  { %v1740_v61 = vpack.c.bf16 %v1101_v60, %v1100_v51 }
 0x4fe   :  { %v766_v0 = vsel %vm765_vm9, %v764_v63, -inf }
 0x4ff   :  { %v767_v1 = vrot.slane %v766_v0, 4 }
 0x501   :  { %v768_v2 = vmax.f32 %v766_v0, %v767_v1 }
 0x502   :  { %v976_v58 = vpop.f32.mrb[4].mxu0 }
 0x503   :  { %v769_v3 = vrot.slane %v768_v2, 2  ;;  %v1623_v59 = vpop.f32.mrb[5].mxu0 }
 0x505   :  { %v770_v4 = vmax.f32 %v768_v2, %v769_v3 }
 0x507   :  { %v771_v5 = vrot.slane %v770_v4, 1 }
 0x509   :  { %v772_v6 = vmax.f32 %v770_v4, %v771_v5  ;;  %v1054_v4 = vld [vmem:[%s2326_s20] sm:$0x1] }
 0x50b   :  { %v773_v7 = vsub.f32 %v764_v63, %v772_v6  ;;  %v1103_v63 = vld [vmem:[%s2327_s21 + $0x18] sm:$0xff]  ;;  %s1843_s21 = smov [#allocation3]  }
 0x50c   :  { %v1743_v2 = vpack.c.bf16 %v1103_v63, %v1102_v62  ;;  %s1420_s6 = sshll.u32 %s1843_s21, 4  ;;  %s1421_s6 = int_to_ptr.vmem [resolvable:$true] %s1420_s6 }
 0x50d   :  { %v774_v8 = vmul.f32 1.442695, %v773_v7  ;;  %s1787_s15 = scalar_lea.vmem %s1421_s6, 16  ;;  %s1791_s18 = scalar_lea.vmem %s1421_s6, 32 }
 0x50e   :  { %p1788_p0 = scmp.ne.s32.totalorder %s1421_s6, %s1787_s15  ;;  %p1792_p1 = scmp.lt.s32.totalorder %s1421_s6, %s1421_s6 }
 0x50f   :  { %1775 = vpow2.f32 %v774_v8  ;;  %p1793_p2 = scmp.lt.s32.totalorder %s1791_s18, %s1787_s15 }
 0x511   :  { %p1794_p3 = por %p1793_p2, %p1792_p1 }
 0x513   :  { %p1795_p4 = pnand %p1794_p3, %p1788_p0 }
 0x519   :  { %v1776_v10 = vpop.eup %1775 }
 0x51a   :  { %v776_v12 = vsel %vm765_vm9, %v1776_v10, 0.0 }
 0x51b   :  { %v777_v13 = vrot.slane %v776_v12, 4 }
 0x51d   :  { %v778_v14 = vadd.f32 %v777_v13, %v776_v12 }
 0x51f   :  { %v779_v15 = vrot.slane %v778_v14, 2 }
 0x521   :  { %v780_v16 = vadd.f32 %v779_v15, %v778_v14 }
 0x523   :  { %v781_v17 = vrot.slane %v780_v16, 1 }
 0x525   :  { %v782_v18 = vadd.f32 %v781_v17, %v780_v16 }
 0x527   :  { %1777 = vrcp.f32 %v782_v18 }
 0x531   :  { %v1778_v19 = vpop.eup %1777 }
 0x532   :  { %v784_v20 = vmul.f32 %v1778_v19, %v1776_v10 }
 0x534   :  { %785 = vxpose.xlu1.b32.start.end [1/1] (short) (narrow) %v784_v20, 8 }
 0x5b4   :  { %v801_v39 = vpop.trf.xlu1 }
 0x5b5   :  { %1611 = vmatmul.mubr.msk.f32.vlgmr.msra.gmra.mrb[10].mxu1 %vm817_vm10, %v801_v39 }
 0x5b6   :  { %1726 = vmatpush3.bf16.msra.mxu1 %v1725_v36  ;;  %1638 = vmatprep.mubr.msk.f32.mxu1 %vm1837_vm0, %v1838_v11 }
 0x5b7   :  { %1727 = vmatprep.subr.bf16.mxu1 %v1836_v9 }
 0x5ba   :  { %1729 = vmatpush3.bf16.msra.mxu1 %v1728_v40 }
 0x5bb   :  { %1730 = vmatprep.subr.bf16.mxu1 %v1836_v9 }
 0x5be   :  { %1732 = vmatpush3.bf16.msra.mxu1 %v1731_v43 }
 0x5bf   :  { %1636 = vmatprep.subr.mxu1 %v1838_v11 }
 0x5c2   :  { %1637 = vmatpush3.msra.mxu1 %v901_v48 }
 0x5c3   :  { %1639 = vmatmul.mubr.msk.f32.vlgmr.msra.gmra.mrb[12].mxu1 %vm980_vm11, %v894_v49  ;;  %1745 = vmatprep.subr.bf16.mxu1 %v1836_v9 }
 0x5c4   :  { %1747 = vmatpush3.bf16.msra.mxu1 %v1746_v50  ;;  %1671 = vmatprep.mubr.msk.f32.mxu1 %vm1837_vm0, %v1838_v11 }
 0x5c5   :  { %1748 = vmatprep.subr.bf16.mxu1 %v1836_v9 }
 0x5c8   :  { %1750 = vmatpush3.bf16.msra.mxu1 %v1749_v55 }
 0x5cb   :  { %1672 = vmatmul.mubr.msk.f32.vlgmr.msra.gmra.mrb[14].mxu1 %vm605_vm6, %v429_v57 }
 0x688   :  { %v890_v0 = vpop.f32.mrb[10].mxu1 }
 0x689   :  { %v1612_v1 = vpop.f32.mrb[11].mxu1  ;;  %1650 = vmatmul.mubr.msk.f32.vlgmr.msra.gmra.mrb[6].mxu0 %vm605_vm6, %v890_v0 }
 0x68a   :  { %1741 = vmatpush3.bf16.msra.mxu0 %v1740_v61  ;;  %1660 = vmatprep.mubr.msk.f32.mxu0 %vm1837_vm0, %v1838_v11 }
 0x68b   :  { %1742 = vmatprep.subr.bf16.mxu0 %v1836_v9 }
 0x68e   :  { %1744 = vmatpush3.bf16.msra.mxu0 %v1743_v2 }
 0x68f   :  { %1751 = vmatprep.subr.bf16.mxu0 %v1836_v9 }
 0x691   :  { %1661 = vmatmul.mubr.msk.f32.vlgmr.msra.gmra.mrb[8].mxu0 %vm605_vm6, %v2128_v45  ;;  %v1471_v45 = vld [vmem:[%s2323_s17] ss:$0 sm:$0xff] }
 0x692   :  { %1682 = vmatprep.mubr.msk.f32.mxu0 %vm1837_vm0, %v1838_v11  ;;  %1753 = vmatpush3.bf16.msra.mxu0 %v1752_v31 }
 0x693   :  { %1754 = vmatprep.subr.bf16.mxu0 %v1836_v9 }
 0x696   :  { %v1050_v3 = vpop.f32.mrb[12].mxu1  ;;  %1756 = vmatpush3.bf16.msra.mxu0 %v1755_v33 }
 0x697   :  { %v1051_v5 = vadd.f32 %v1050_v3, %v976_v58  ;;  %v1640_v6 = vpop.f32.mrb[13].mxu1 }
 0x699   :  { %v1055_v7 = vadd.f32 %v1054_v4, %v1051_v5 }
 0x69b   :  { %1779 = vtanh.f32 %v1055_v7  ;;  %v1470_v11 = vmul.f32 -1.442695, %v1055_v7 }
 0x69d   :  { %1781 = vpow2.f32 %v1470_v11 }
 0x69e   :  { %v1328_v8 = vpop.f32.mrb[14].mxu1 }
 0x69f   :  { %v1673_v10 = vpop.f32.mrb[15].mxu1 }
 0x6a5   :  { %v1780_v12 = vpop.eup %1779 }
 0x6a6   :  { %1074 = vrot.lane.b32.xlu0 %v1780_v12, %s1840_s14 }
 0x6a7   :  { %v1782_v13 = vpop.eup %1781 }
 0x6a8   :  { %v1059_v14 = vadd.f32 1.0, %v1782_v13 }
 0x6aa   :  { %1069 = vrot.lane.b32.xlu0 %v1471_v45, %s1841_s28  ;;  %1783 = vrcp.f32 %v1059_v14 }
 0x6b4   :  { %v1784_v15 = vpop.eup %1783 }
 0x718   :  { %v1075_v16 = vpop.permute.xlu0 %1074 }
 0x719   :  { %v1077_v17 = vmul.f32 %v1784_v15, %v1075_v16 }
 0x71b   :  { %1079 = vrot.lane.b32.xlu0 %v1077_v17, %s1841_s28 }
 0x71c   :  { %v1070_v24 = vpop.permute.xlu0 %1069 }
 0x71d   :  { %v1072_v25 = vmul.f32 %v1784_v15, %v1070_v24 }
 0x75c   :  { %v1185_v18 = vpop.f32.mrb[6].mxu0 }
 0x75d   :  { %v1651_v19 = vpop.f32.mrb[7].mxu0 }
 0x764   :  { %v1255_v20 = vpop.f32.mrb[8].mxu0 }
 0x765   :  { %v1256_v21 = vadd.f32 %v1255_v20, %v1185_v18  ;;  %v1662_v22 = vpop.f32.mrb[9].mxu0 }
 0x767   :  { %v2254_v23 = vadd.f32 %v1328_v8, %v1256_v21 }
 0x78d   :  { %v1080_v26 = vpop.permute.xlu0 %1079 }
 0x78e   :  { %v1082_v27 = vadd.f32 %v1080_v26, %v1072_v25 }
 0x790   :  { %1785 = vtanh.f32 %v1082_v27 }
 0x79a   :  { %v1786_v34 = vpop.eup %1785 }
 0x79b   :  { %1085 = vrot.lane.b32.xlu0 %v1786_v34, %s1840_s14 }
 0x80d   :  { %v1086_v35 = vpop.permute.xlu0 %1085 }
 0x80e   :  { %v1088_v36 = vmul.f32 %v1784_v15, %v1086_v35 }
 0x810   :  { %1090 = vrot.lane.b32.xlu0 %v1088_v36, %s1841_s28 }
 0x814   :  { %1096 = vrot.lane.b32.xlu0 %v1082_v27, %s1842_s2 }
 0x882   :  { %v1091_v37 = vpop.permute.xlu0 %1090 }
 0x883   :  { %1683 = vmatmul.mubr.msk.f32.vlgmr.msra.gmra.mrb[10].mxu0 %vm605_vm6, %v1091_v37  ;;  %1094 = vst.msk [vmem:[#allocation3] sm:$0x1] %vm1093_vm13, %v1091_v37 }
 0x886   :  { %v1097_v38 = vpop.permute.xlu0 %1096 }
 0x887   :  { %1099 = vst.msk [vmem:[#allocation5] sm:$0x1] %vm1093_vm13, %v1097_v38 }
 0x888   :  { %1798 = shalt.err (!%p1795_p4)
}
 0x889   :  { %s1799_s0 = scalar_lea.hbm %s2330_s24, 16 }
 0x88a   :  { %p1800_p5 = scmp.ne.s32.totalorder %s2330_s24, %s1799_s0  ;;  %p1803_p6 = scmp.lt.u32.totalorder %s1799_s0, %s2330_s24 }
 0x88c   :  { %p1805_p7 = pnand %p1803_p6, %p1800_p5 }
 0x88e   :  { %1808 = shalt.err (!%p1805_p7)
}
 0x88f   :  { %1423 = dma.vmem_to_hbm [thread:$0]  %s1421_s6, 16, %s2330_s24, [#allocation4]  }
 0x890   :  { %s1809_s27 = scalar_lea.vmem %s1431_s12, 16  ;;  %s1813_s4 = scalar_lea.vmem %s1431_s12, 32 }
 0x891   :  { %p1810_p8 = scmp.ne.s32.totalorder %s1431_s12, %s1809_s27  ;;  %p1814_p9 = scmp.lt.s32.totalorder %s1431_s12, %s1431_s12 }
 0x892   :  { %p1815_p10 = scmp.lt.s32.totalorder %s1813_s4, %s1809_s27 }
 0x894   :  { %p1816_p11 = por %p1815_p10, %p1814_p9 }
 0x896   :  { %p1817_p12 = pnand %p1816_p11, %p1810_p8 }
 0x898   :  { %1820 = shalt.err (!%p1817_p12)
}
 0x899   :  { %s1821_s20 = scalar_lea.hbm %s2331_s25, 16 }
 0x89a   :  { %p1822_p13 = scmp.ne.s32.totalorder %s2331_s25, %s1821_s20  ;;  %p1825_p0 = scmp.lt.u32.totalorder %s1821_s20, %s2331_s25 }
 0x89c   :  { %p1827_p1 = pnand %p1825_p0, %p1822_p13 }
 0x89e   :  { %1830 = shalt.err (!%p1827_p1)
}
 0x89f   :  { %1433 = dma.vmem_to_hbm [thread:$0]  %s1431_s12, 16, %s2331_s25, [#allocation6]   ;;  %v1406_v39 = vld [vmem:[%s2328_s22] sm:$0x1] }
 0x956   :  { %v1401_v9 = vpop.f32.mrb[10].mxu0 }
 0x957   :  { %v1405_v40 = vadd.f32 %v1401_v9, %v2254_v23  ;;  %v1684_v41 = vpop.f32.mrb[11].mxu0 }
 0x959   :  { %v1407_v42 = vadd.f32 %v1406_v39, %v1405_v40 }
 0x95b   :  { %vm1408_vm14 = vcmp.ge.f32.partialorder %v1407_v42, 0.0  ;;  %v1409_v43 = vmul.f32 0.25, %v1407_v42 }
 0x95d   :  { %v1410_v44 = vsel %vm1408_vm14, %v1407_v42, %v1409_v43 }
 0x95e   :  { %1411 = vst.msk [vmem:[%s2329_s23] sm:$0x1] %vm1093_vm13, %v1410_v44 }
 0x95f   :  { %1831 = dma.done.wait [#allocation4], 16  }
 0x960   :  { %1832 = vsyncadd [#allocation4], 4294967280 }
 0x961   :  { %1833 = dma.done.wait [#allocation6], 16  }
 0x962   :  { %1834 = vsyncadd [#allocation6], 4294967280 }
 0x963   :  { %1442 = vsyncpa [#allocation4], 1 }
 0x964   :  { %1443 = vsyncpa [#allocation6], 1 }

</bundles_post_ra>
